<compile_context>
chip_gen: v6e
topology: v6e:2x2x1
jax: 0.10.0
libtpu: 0.0.40
codegen_flags: <defaults>
</compile_context>

<pallas_src>
import functools

import jax
import jax.numpy as jnp
import numpy as np
from jax.experimental import pallas as pl
from jax.experimental.pallas import tpu as pltpu


def attention_kernel(feat_ref, wah_ref, uw_ref, ub_ref, aw_ref,
                     alpha_ref, ctx_ref, *, valid_len, a_chunk):
    """One grid step processes TB batch rows; L is pre-padded to a multiple of 128."""
    tb, l_pad, e_dim = feat_ref.shape
    a_dim = uw_ref.shape[1]

    feat = feat_ref[...]                                   # (TB, L_pad, E) in_dtype
    wah = wah_ref[...]                                     # (TB, 1, A)     f32

    # Fold the batch into the matmul M dimension. L_pad % 128 == 0, so this
    # reshape is layout-preserving (no relayout copy).
    feat2d = feat.reshape(tb * l_pad, e_dim)

    # scores[b, l] = sum_a Aw[a] * tanh(U(feat)[b,l,a] + Ub[a] + w_ah[b,a]).
    # Chunk the A axis so the f32 temporaries stay vreg-sized at production A.
    scores = jnp.zeros((tb, l_pad), jnp.float32)
    for a0 in range(0, a_dim, a_chunk):
        a1 = min(a0 + a_chunk, a_dim)
        ac = a1 - a0
        u_c = jnp.dot(feat2d, uw_ref[:, a0:a1],
                      preferred_element_type=jnp.float32)            # (TB*L_pad, Ac)
        u_c = u_c.reshape(tb, l_pad, ac)                             # layout-free split
        comb = jnp.tanh(u_c
                        + ub_ref[:, a0:a1].reshape(1, 1, ac)
                        + wah[:, :, a0:a1])                          # (TB, L_pad, Ac) f32
        # Lane-axis (XLU) reduce; if XLU ever shows on the critical path at large A,
        # fold this into an MXU matvec instead.
        scores = scores + jnp.sum(comb * aw_ref[:, a0:a1].reshape(1, 1, ac), axis=-1)

    # Mask padded positions so they get exactly zero softmax weight.
    if valid_len < l_pad:
        lane = jax.lax.broadcasted_iota(jnp.int32, (tb, l_pad), 1)
        scores = jnp.where(lane < valid_len, scores, -1e30)

    # Softmax over L (lane axis); reciprocal goes to the EUP slot.
    m = jnp.max(scores, axis=-1, keepdims=True)
    p = jnp.exp(scores - m)
    denom = jnp.sum(p, axis=-1, keepdims=True)
    alpha = p * pl.reciprocal(denom, approx=True)                    # (TB, L_pad) f32
    alpha_ref[...] = alpha[:, None, :].astype(alpha_ref.dtype)       # lane-dense store

    # context = sum_L(features * alpha) as a batched MXU contraction:
    # (TB,1,L_pad) @ (TB,L_pad,E) -> (TB,1,E); padded rows contribute 0.
    ctx = jnp.einsum("bql,ble->bqe",
                     alpha[:, None, :].astype(feat.dtype), feat,
                     preferred_element_type=jnp.float32)             # (TB, 1, E) f32
    ctx_ref[...] = ctx.astype(ctx_ref.dtype)


def _round_up(x, m):
    return ((x + m - 1) // m) * m


def _vmem_limit_bytes():
    # v7x: 64 MiB physical VMEM -> leave headroom (48 MiB). v4/v5e/v6e: 128 MiB ->
    # the scoped limit can be pushed toward ~100 MiB for larger feature tiles /
    # deeper buffering.
    try:
        kind = jax.devices()[0].device_kind.lower()
    except Exception:
        kind = ""
    if any(tag in kind for tag in ("v4", "v5", "v6")):
        return 100 * 1024 * 1024
    return 48 * 1024 * 1024


def attention_forward(features, hidden_state, params, *,
                      in_dtype=jnp.bfloat16, out_dtype=jnp.float32,
                      batch_tile=None, target_m_rows=512, a_chunk=256,
                      min_grid_steps=4):
    """Pallas forward. Returns (alpha (B,L) f32, context (B,E) out_dtype).

    in_dtype: MXU-operand dtype (features / Uw / context contraction). bf16 is the
      default on ALL generations; elementwise math stays f32 regardless.
    out_dtype: context output dtype (bf16 halves writeback bytes if downstream
      accepts it; default f32 to match the PyTorch module)."""
    B, L, E = features.shape
    A = params["Uw"].shape[1]

    # Pad L to a lane multiple: lane-dense alpha stores + layout-free batch fold.
    L_pad = _round_up(L, 128)

    # Batch tile: aim for TB*L_pad ~ target_m_rows MXU rows per step, but keep at
    # least `min_grid_steps` grid steps so the pipeline has a next tile to prefetch
    # and the "parallel" axis can shard across both v7x TensorCores.
    if batch_tile is None:
        tb_for_m = max(1, target_m_rows // L_pad)
        tb_for_steps = max(1, B // min_grid_steps)
        TB = max(1, min(B, tb_for_m, tb_for_steps))
    else:
        TB = max(1, min(B, batch_tile))
    while B % TB:          # keep full blocks (no garbage rows from partial tiles)
        TB -= 1
    grid = (B // TB,)

    feats = features.astype(in_dtype)
    if L_pad != L:
        feats = jnp.pad(feats, ((0, 0), (0, L_pad - L), (0, 0)))

    # Hoist W(hidden): one tiny (B,D)@(D,A) matmul in XLA, in f32.
    w_ah = (hidden_state.astype(jnp.float32) @ params["Ww"].astype(jnp.float32)
            + params["Wb"].astype(jnp.float32).reshape(1, A))        # (B, A) f32
    w_ah = w_ah.reshape(B, 1, A)

    uw = params["Uw"].astype(in_dtype)                                # (E, A)
    ub = params["Ub"].astype(jnp.float32).reshape(1, A)
    aw_row = params["Aw"].astype(jnp.float32).reshape(1, A)           # (A,1) -> (1,A)
    # params["Ab"] intentionally unused: constant logit offset cancels in softmax.

    kernel = functools.partial(attention_kernel, valid_len=L, a_chunk=a_chunk)
    const = lambda b: (0, 0)

    def build_and_call(single_buffer_weights):
        resident = ({"pipeline_mode": pl.Buffered(1)}
                    if single_buffer_weights else {})
        grid_spec = pltpu.PrefetchScalarGridSpec(
            num_scalar_prefetch=0,
            grid=grid,
            in_specs=[
                pl.BlockSpec((TB, L_pad, E), lambda b: (b, 0, 0)),    # features
                pl.BlockSpec((TB, 1, A),     lambda b: (b, 0, 0)),    # hoisted w_ah
                pl.BlockSpec((E, A), const, **resident),              # U weight
                pl.BlockSpec((1, A), const, **resident),              # U bias
                pl.BlockSpec((1, A), const, **resident),              # A weight (row)
            ],
            out_specs=[
                pl.BlockSpec((TB, 1, L_pad), lambda b: (b, 0, 0)),    # alpha
                pl.BlockSpec((TB, 1, E),     lambda b: (b, 0, 0)),    # context
            ],
        )
        return pl.pallas_call(
            kernel,
            out_shape=(
                jax.ShapeDtypeStruct((B, 1, L_pad), jnp.float32),
                jax.ShapeDtypeStruct((B, 1, E), out_dtype),
            ),
            grid_spec=grid_spec,
            compiler_params=pltpu.CompilerParams(
                dimension_semantics=("parallel",),   # batch tiles shard across TCs
                vmem_limit_bytes=_vmem_limit_bytes(),
            ),
        )(feats, w_ah, uw, ub, aw_row)

    try:
        # Constant-index-map operands never change block -> single-buffer them.
        alpha_p, ctx = build_and_call(True)
    except Exception:
        # Fallback for jax versions without single-buffer pipeline_mode support.
        alpha_p, ctx = build_and_call(False)

    return alpha_p[:, 0, :L], ctx[:, 0, :]


def attention_reference(features, hidden_state, params):
    # Pure-JAX reference mirroring the PyTorch forward exactly (including Ab).
    u_hs = features @ params["Uw"] + params["Ub"]                 # (B, L, A)
    w_ah = hidden_state @ params["Ww"] + params["Wb"]             # (B, A)
    combined = jnp.tanh(u_hs + w_ah[:, None, :])                  # (B, L, A)
    scores = (combined @ params["Aw"] + params["Ab"])[..., 0]     # (B, L)
    alpha = jax.nn.softmax(scores, axis=1)                        # (B, L)
    ctx = jnp.sum(features * alpha[:, :, None], axis=1)           # (B, E)
    return alpha, ctx


if __name__ == "__main__":
    # Small shapes consistent with the module (image-region attention).
    B, L = 8, 16                  # batch, num_pixels
    encoder_dim, decoder_dim, attention_dim = 32, 16, 32

    key = jax.random.PRNGKey(0)
    kf, kh, k1, k2, k3, k4, k5, k6 = jax.random.split(key, 8)

    features = jax.random.normal(kf, (B, L, encoder_dim), jnp.float32)
    hidden_state = jax.random.normal(kh, (B, decoder_dim), jnp.float32)

    # Linear weights stored pre-transposed as (in_features, out_features).
    params = {
        "Uw": 0.1 * jax.random.normal(k1, (encoder_dim, attention_dim), jnp.float32),
        "Ub": 0.1 * jax.random.normal(k2, (1, attention_dim), jnp.float32),
        "Ww": 0.1 * jax.random.normal(k3, (decoder_dim, attention_dim), jnp.float32),
        "Wb": 0.1 * jax.random.normal(k4, (1, attention_dim), jnp.float32),
        "Aw": 0.1 * jax.random.normal(k5, (attention_dim, 1), jnp.float32),
        "Ab": 0.1 * jax.random.normal(k6, (1, 1), jnp.float32),
    }

    alpha_ref, ctx_ref = attention_reference(features, hidden_state, params)

    # f32 MXU-operand path: tight match (tolerance covers the EUP approx reciprocal).
    alpha32, ctx32 = attention_forward(features, hidden_state, params,
                                       in_dtype=jnp.float32)
    jax.block_until_ready((alpha32, ctx32))
    np.testing.assert_allclose(np.asarray(alpha32), np.asarray(alpha_ref),
                               rtol=5e-3, atol=1e-5)
    np.testing.assert_allclose(np.asarray(ctx32), np.asarray(ctx_ref),
                               rtol=5e-3, atol=1e-5)

    # Default path: bf16 MXU operands on every generation; elementwise math f32.
    alpha_bf, ctx_bf = attention_forward(features, hidden_state, params)
    jax.block_until_ready((alpha_bf, ctx_bf))
    np.testing.assert_allclose(np.asarray(alpha_bf), np.asarray(alpha_ref),
                               rtol=5e-2, atol=5e-3)
    np.testing.assert_allclose(np.asarray(ctx_bf), np.asarray(ctx_ref),
                               rtol=5e-2, atol=5e-3)

    print("KERNEL_OK")
</pallas_src>

<mosaic_0001>
module attributes {stable_mosaic.version = 11 : i64} {
  func.func @attention_kernel(%arg0: i32, %arg1: memref<2x128x32xf32, #tpu.memory_space<vmem>>, %arg2: memref<2x1x32xf32, #tpu.memory_space<vmem>>, %arg3: memref<32x32xf32, #tpu.memory_space<vmem>>, %arg4: memref<1x32xf32, #tpu.memory_space<vmem>>, %arg5: memref<1x32xf32, #tpu.memory_space<vmem>>, %arg6: memref<2x1x128xf32, #tpu.memory_space<vmem>>, %arg7: memref<2x1x32xf32, #tpu.memory_space<vmem>>) attributes {dimension_semantics = [#tpu.dimension_semantics<parallel>], iteration_bounds = array<i64: 4>, scalar_prefetch = 0 : i64, scratch_operands = 0 : i64, tpu.core_type = #tpu.core_type<tc>, window_params = [{transform_indices = @transform_0, window_bounds = array<i64: 2, 128, 32>}, {transform_indices = @transform_1, window_bounds = array<i64: 2, 1, 32>}, {pipeline_mode = #tpu.pipeline_mode<synchronous>, transform_indices = @transform_2, window_bounds = array<i64: 32, 32>}, {pipeline_mode = #tpu.pipeline_mode<synchronous>, transform_indices = @transform_3, window_bounds = array<i64: 1, 32>}, {pipeline_mode = #tpu.pipeline_mode<synchronous>, transform_indices = @transform_4, window_bounds = array<i64: 1, 32>}, {transform_indices = @transform_5, window_bounds = array<i64: 2, 1, 128>}, {transform_indices = @transform_6, window_bounds = array<i64: 2, 1, 32>}]} {
    %c0 = arith.constant 0 : index
    %c0_0 = arith.constant 0 : index
    %c0_1 = arith.constant 0 : index
    %0 = vector.load %arg1[%c0, %c0_0, %c0_1] : memref<2x128x32xf32, #tpu.memory_space<vmem>>, vector<2x128x32xf32>
    %c0_2 = arith.constant 0 : index
    %c0_3 = arith.constant 0 : index
    %c0_4 = arith.constant 0 : index
    %1 = vector.load %arg2[%c0_2, %c0_3, %c0_4] : memref<2x1x32xf32, #tpu.memory_space<vmem>>, vector<2x1x32xf32>
    %2 = vector.shape_cast %0 : vector<2x128x32xf32> to vector<256x32xf32>
    %cst = arith.constant 0.000000e+00 : f32
    %3 = vector.broadcast %cst : f32 to vector<2x128xf32>
    %c0_5 = arith.constant 0 : index
    %c0_6 = arith.constant 0 : index
    %4 = vector.load %arg3[%c0_5, %c0_6] : memref<32x32xf32, #tpu.memory_space<vmem>>, vector<32x32xf32>
    %cst_7 = arith.constant dense<0.000000e+00> : vector<256x32xf32>
    %5 = tpu.matmul %2, %4, %cst_7 {dimension_numbers = #tpu.dot_dimension_numbers<[1], [0], [0], [1], [0, 0, 1, 1], [], []>} : vector<256x32xf32>, vector<32x32xf32>, vector<256x32xf32> -> vector<256x32xf32>
    %6 = vector.shape_cast %5 : vector<256x32xf32> to vector<2x128x32xf32>
    %c0_8 = arith.constant 0 : index
    %c0_9 = arith.constant 0 : index
    %7 = vector.load %arg4[%c0_8, %c0_9] : memref<1x32xf32, #tpu.memory_space<vmem>>, vector<1x32xf32>
    %8 = vector.shape_cast %7 : vector<1x32xf32> to vector<1x1x32xf32>
    %9 = vector.broadcast %8 : vector<1x1x32xf32> to vector<2x128x32xf32>
    %10 = arith.addf %6, %9 : vector<2x128x32xf32>
    %11 = vector.broadcast %1 : vector<2x1x32xf32> to vector<2x128x32xf32>
    %12 = arith.addf %10, %11 : vector<2x128x32xf32>
    %13 = math.tanh %12 : vector<2x128x32xf32>
    %c0_10 = arith.constant 0 : index
    %c0_11 = arith.constant 0 : index
    %14 = vector.load %arg5[%c0_10, %c0_11] : memref<1x32xf32, #tpu.memory_space<vmem>>, vector<1x32xf32>
    %15 = vector.shape_cast %14 : vector<1x32xf32> to vector<1x1x32xf32>
    %16 = vector.broadcast %15 : vector<1x1x32xf32> to vector<2x128x32xf32>
    %17 = arith.mulf %13, %16 : vector<2x128x32xf32>
    %cst_12 = arith.constant dense<0.000000e+00> : vector<2x128xf32>
    %18 = vector.multi_reduction <add>, %17, %cst_12 [2] : vector<2x128x32xf32> to vector<2x128xf32>
    %19 = arith.addf %3, %18 : vector<2x128xf32>
    %20 = tpu.iota {dimensions = array<i32: 1>} : vector<2x128xi32>
    %c16_i32 = arith.constant 16 : i32
    %21 = vector.broadcast %c16_i32 : i32 to vector<2x128xi32>
    %22 = arith.cmpi slt, %20, %21 : vector<2x128xi32>
    %cst_13 = arith.constant -1.000000e+30 : f32
    %23 = vector.broadcast %cst_13 : f32 to vector<2x128xf32>
    %24 = arith.select %22, %19, %23 : vector<2x128xi1>, vector<2x128xf32>
    %cst_14 = arith.constant dense<0xFF800000> : vector<2xf32>
    %25 = vector.multi_reduction <maximumf>, %24, %cst_14 [1] : vector<2x128xf32> to vector<2xf32>
    %26 = vector.shape_cast %25 : vector<2xf32> to vector<2x1xf32>
    %27 = vector.broadcast %26 : vector<2x1xf32> to vector<2x128xf32>
    %28 = arith.subf %24, %27 : vector<2x128xf32>
    %29 = math.exp %28 : vector<2x128xf32>
    %cst_15 = arith.constant dense<0.000000e+00> : vector<2xf32>
    %30 = vector.multi_reduction <add>, %29, %cst_15 [1] : vector<2x128xf32> to vector<2xf32>
    %31 = vector.shape_cast %30 : vector<2xf32> to vector<2x1xf32>
    %32 = tpu.reciprocal %31 {approx = true} : vector<2x1xf32> -> vector<2x1xf32>
    %33 = vector.broadcast %32 : vector<2x1xf32> to vector<2x128xf32>
    %34 = arith.mulf %29, %33 : vector<2x128xf32>
    %35 = vector.shape_cast %34 : vector<2x128xf32> to vector<2x1x128xf32>
    %c0_16 = arith.constant 0 : index
    %c0_17 = arith.constant 0 : index
    %c0_18 = arith.constant 0 : index
    %36 = vector.load %arg6[%c0_16, %c0_17, %c0_18] : memref<2x1x128xf32, #tpu.memory_space<vmem>>, vector<2x1x128xf32>
    tpu.vector_store %arg6[%c0_16, %c0_17, %c0_18], %35 {strides = array<i32>} : memref<2x1x128xf32, #tpu.memory_space<vmem>>, vector<2x1x128xf32>,
    %37 = vector.shape_cast %34 : vector<2x128xf32> to vector<2x1x128xf32>
    "tpu.trace_start"() <{level = 10 : i32, message = "bql,ble->bqe"}> : () -> ()
    %cst_19 = arith.constant dense<0.000000e+00> : vector<2x1x32xf32>
    %38 = tpu.matmul %37, %0, %cst_19 {dimension_numbers = #tpu.dot_dimension_numbers<[2], [1], [1], [2], [0, 0, 0, 1, 1, 2], [0], [0]>} : vector<2x1x128xf32>, vector<2x128x32xf32>, vector<2x1x32xf32> -> vector<2x1x32xf32>
    "tpu.trace_stop"() : () -> ()
    %c0_20 = arith.constant 0 : index
    %c0_21 = arith.constant 0 : index
    %c0_22 = arith.constant 0 : index
    %39 = vector.load %arg7[%c0_20, %c0_21, %c0_22] : memref<2x1x32xf32, #tpu.memory_space<vmem>>, vector<2x1x32xf32>
    tpu.vector_store %arg7[%c0_20, %c0_21, %c0_22], %38 {strides = array<i32>} : memref<2x1x32xf32, #tpu.memory_space<vmem>>, vector<2x1x32xf32>,
    return
  }
  func.func @transform_0(%arg0: i32) -> (i32, i32, i32) {
    %c0_i32 = arith.constant 0 : i32
    %c0_i32_0 = arith.constant 0 : i32
    %c0_i32_1 = arith.constant 0 : i32
    return %arg0, %c0_i32, %c0_i32_0 : i32, i32, i32
  }
  func.func @transform_1(%arg0: i32) -> (i32, i32, i32) {
    %c0_i32 = arith.constant 0 : i32
    %c0_i32_0 = arith.constant 0 : i32
    %c0_i32_1 = arith.constant 0 : i32
    return %arg0, %c0_i32, %c0_i32_0 : i32, i32, i32
  }
  func.func @transform_2(%arg0: i32) -> (i32, i32) {
    %c0_i32 = arith.constant 0 : i32
    %c0_i32_0 = arith.constant 0 : i32
    %c0_i32_1 = arith.constant 0 : i32
    return %c0_i32, %c0_i32_0 : i32, i32
  }
  func.func @transform_3(%arg0: i32) -> (i32, i32) {
    %c0_i32 = arith.constant 0 : i32
    %c0_i32_0 = arith.constant 0 : i32
    %c0_i32_1 = arith.constant 0 : i32
    return %c0_i32, %c0_i32_0 : i32, i32
  }
  func.func @transform_4(%arg0: i32) -> (i32, i32) {
    %c0_i32 = arith.constant 0 : i32
    %c0_i32_0 = arith.constant 0 : i32
    %c0_i32_1 = arith.constant 0 : i32
    return %c0_i32, %c0_i32_0 : i32, i32
  }
  func.func @transform_5(%arg0: i32) -> (i32, i32, i32) {
    %c0_i32 = arith.constant 0 : i32
    %c0_i32_0 = arith.constant 0 : i32
    %c0_i32_1 = arith.constant 0 : i32
    return %arg0, %c0_i32, %c0_i32_0 : i32, i32, i32
  }
  func.func @transform_6(%arg0: i32) -> (i32, i32, i32) {
    %c0_i32 = arith.constant 0 : i32
    %c0_i32_0 = arith.constant 0 : i32
    %c0_i32_1 = arith.constant 0 : i32
    return %arg0, %c0_i32, %c0_i32_0 : i32, i32, i32
  }
}

module attributes {stable_mosaic.version = 11 : i64} {
  func.func @attention_kernel(%arg0: i32, %arg1: memref<2x128x32xf32, #tpu.memory_space<vmem>>, %arg2: memref<2x1x32xf32, #tpu.memory_space<vmem>>, %arg3: memref<32x32xf32, #tpu.memory_space<vmem>>, %arg4: memref<1x32xf32, #tpu.memory_space<vmem>>, %arg5: memref<1x32xf32, #tpu.memory_space<vmem>>, %arg6: memref<2x1x128xf32, #tpu.memory_space<vmem>>, %arg7: memref<2x1x32xf32, #tpu.memory_space<vmem>>) attributes {dimension_semantics = [#tpu.dimension_semantics<parallel>], iteration_bounds = array<i64: 4>, scalar_prefetch = 0 : i64, scratch_operands = 0 : i64, tpu.core_type = #tpu.core_type<tc>, window_params = [{transform_indices = @transform_0, window_bounds = array<i64: 2, 128, 32>}, {transform_indices = @transform_1, window_bounds = array<i64: 2, 1, 32>}, {pipeline_mode = #tpu.pipeline_mode<synchronous>, transform_indices = @transform_2, window_bounds = array<i64: 32, 32>}, {pipeline_mode = #tpu.pipeline_mode<synchronous>, transform_indices = @transform_3, window_bounds = array<i64: 1, 32>}, {pipeline_mode = #tpu.pipeline_mode<synchronous>, transform_indices = @transform_4, window_bounds = array<i64: 1, 32>}, {transform_indices = @transform_5, window_bounds = array<i64: 2, 1, 128>}, {transform_indices = @transform_6, window_bounds = array<i64: 2, 1, 32>}]} {
    %c0 = arith.constant 0 : index
    %c0_0 = arith.constant 0 : index
    %c0_1 = arith.constant 0 : index
    %0 = vector.load %arg1[%c0, %c0_0, %c0_1] : memref<2x128x32xf32, #tpu.memory_space<vmem>>, vector<2x128x32xf32>
    %c0_2 = arith.constant 0 : index
    %c0_3 = arith.constant 0 : index
    %c0_4 = arith.constant 0 : index
    %1 = vector.load %arg2[%c0_2, %c0_3, %c0_4] : memref<2x1x32xf32, #tpu.memory_space<vmem>>, vector<2x1x32xf32>
    %2 = vector.shape_cast %0 : vector<2x128x32xf32> to vector<256x32xf32>
    %cst = arith.constant 0.000000e+00 : f32
    %3 = vector.broadcast %cst : f32 to vector<2x128xf32>
    %c0_5 = arith.constant 0 : index
    %c0_6 = arith.constant 0 : index
    %4 = vector.load %arg3[%c0_5, %c0_6] : memref<32x32xf32, #tpu.memory_space<vmem>>, vector<32x32xf32>
    %cst_7 = arith.constant dense<0.000000e+00> : vector<256x32xf32>
    %5 = tpu.matmul %2, %4, %cst_7 {dimension_numbers = #tpu.dot_dimension_numbers<[1], [0], [0], [1], [0, 0, 1, 1], [], []>} : vector<256x32xf32>, vector<32x32xf32>, vector<256x32xf32> -> vector<256x32xf32>
    %6 = vector.shape_cast %5 : vector<256x32xf32> to vector<2x128x32xf32>
    %c0_8 = arith.constant 0 : index
    %c0_9 = arith.constant 0 : index
    %7 = vector.load %arg4[%c0_8, %c0_9] : memref<1x32xf32, #tpu.memory_space<vmem>>, vector<1x32xf32>
    %8 = vector.shape_cast %7 : vector<1x32xf32> to vector<1x1x32xf32>
    %9 = vector.broadcast %8 : vector<1x1x32xf32> to vector<2x128x32xf32>
    %10 = arith.addf %6, %9 : vector<2x128x32xf32>
    %11 = vector.broadcast %1 : vector<2x1x32xf32> to vector<2x128x32xf32>
    %12 = arith.addf %10, %11 : vector<2x128x32xf32>
    %13 = math.tanh %12 : vector<2x128x32xf32>
    %c0_10 = arith.constant 0 : index
    %c0_11 = arith.constant 0 : index
    %14 = vector.load %arg5[%c0_10, %c0_11] : memref<1x32xf32, #tpu.memory_space<vmem>>, vector<1x32xf32>
    %15 = vector.shape_cast %14 : vector<1x32xf32> to vector<1x1x32xf32>
    %16 = vector.broadcast %15 : vector<1x1x32xf32> to vector<2x128x32xf32>
    %17 = arith.mulf %13, %16 : vector<2x128x32xf32>
    %cst_12 = arith.constant dense<0.000000e+00> : vector<2x128xf32>
    %18 = vector.multi_reduction <add>, %17, %cst_12 [2] : vector<2x128x32xf32> to vector<2x128xf32>
    %19 = arith.addf %3, %18 : vector<2x128xf32>
    %20 = tpu.iota {dimensions = array<i32: 1>} : vector<2x128xi32>
    %c16_i32 = arith.constant 16 : i32
    %21 = vector.broadcast %c16_i32 : i32 to vector<2x128xi32>
    %22 = arith.cmpi slt, %20, %21 : vector<2x128xi32>
    %cst_13 = arith.constant -1.000000e+30 : f32
    %23 = vector.broadcast %cst_13 : f32 to vector<2x128xf32>
    %24 = arith.select %22, %19, %23 : vector<2x128xi1>, vector<2x128xf32>
    %cst_14 = arith.constant dense<0xFF800000> : vector<2xf32>
    %25 = vector.multi_reduction <maximumf>, %24, %cst_14 [1] : vector<2x128xf32> to vector<2xf32>
    %26 = vector.shape_cast %25 : vector<2xf32> to vector<2x1xf32>
    %27 = vector.broadcast %26 : vector<2x1xf32> to vector<2x128xf32>
    %28 = arith.subf %24, %27 : vector<2x128xf32>
    %29 = math.exp %28 : vector<2x128xf32>
    %cst_15 = arith.constant dense<0.000000e+00> : vector<2xf32>
    %30 = vector.multi_reduction <add>, %29, %cst_15 [1] : vector<2x128xf32> to vector<2xf32>
    %31 = vector.shape_cast %30 : vector<2xf32> to vector<2x1xf32>
    %32 = tpu.reciprocal %31 {approx = true} : vector<2x1xf32> -> vector<2x1xf32>
    %33 = vector.broadcast %32 : vector<2x1xf32> to vector<2x128xf32>
    %34 = arith.mulf %29, %33 : vector<2x128xf32>
    %35 = vector.shape_cast %34 : vector<2x128xf32> to vector<2x1x128xf32>
    %c0_16 = arith.constant 0 : index
    %c0_17 = arith.constant 0 : index
    %c0_18 = arith.constant 0 : index
    %36 = vector.load %arg6[%c0_16, %c0_17, %c0_18] : memref<2x1x128xf32, #tpu.memory_space<vmem>>, vector<2x1x128xf32>
    tpu.vector_store %arg6[%c0_16, %c0_17, %c0_18], %35 {strides = array<i32>} : memref<2x1x128xf32, #tpu.memory_space<vmem>>, vector<2x1x128xf32>,
    %37 = vector.shape_cast %34 : vector<2x128xf32> to vector<2x1x128xf32>
    "tpu.trace_start"() <{level = 10 : i32, message = "bql,ble->bqe"}> : () -> ()
    %cst_19 = arith.constant dense<0.000000e+00> : vector<2x1x32xf32>
    %38 = tpu.matmul %37, %0, %cst_19 {dimension_numbers = #tpu.dot_dimension_numbers<[2], [1], [1], [2], [0, 0, 0, 1, 1, 2], [0], [0]>} : vector<2x1x128xf32>, vector<2x128x32xf32>, vector<2x1x32xf32> -> vector<2x1x32xf32>
    "tpu.trace_stop"() : () -> ()
    %c0_20 = arith.constant 0 : index
    %c0_21 = arith.constant 0 : index
    %c0_22 = arith.constant 0 : index
    %39 = vector.load %arg7[%c0_20, %c0_21, %c0_22] : memref<2x1x32xf32, #tpu.memory_space<vmem>>, vector<2x1x32xf32>
    tpu.vector_store %arg7[%c0_20, %c0_21, %c0_22], %38 {strides = array<i32>} : memref<2x1x32xf32, #tpu.memory_space<vmem>>, vector<2x1x32xf32>,
    return
  }
  func.func @transform_0(%arg0: i32) -> (i32, i32, i32) {
    %c0_i32 = arith.constant 0 : i32
    %c0_i32_0 = arith.constant 0 : i32
    %c0_i32_1 = arith.constant 0 : i32
    return %arg0, %c0_i32, %c0_i32_0 : i32, i32, i32
  }
  func.func @transform_1(%arg0: i32) -> (i32, i32, i32) {
    %c0_i32 = arith.constant 0 : i32
    %c0_i32_0 = arith.constant 0 : i32
    %c0_i32_1 = arith.constant 0 : i32
    return %arg0, %c0_i32, %c0_i32_0 : i32, i32, i32
  }
  func.func @transform_2(%arg0: i32) -> (i32, i32) {
    %c0_i32 = arith.constant 0 : i32
    %c0_i32_0 = arith.constant 0 : i32
    %c0_i32_1 = arith.constant 0 : i32
    return %c0_i32, %c0_i32_0 : i32, i32
  }
  func.func @transform_3(%arg0: i32) -> (i32, i32) {
    %c0_i32 = arith.constant 0 : i32
    %c0_i32_0 = arith.constant 0 : i32
    %c0_i32_1 = arith.constant 0 : i32
    return %c0_i32, %c0_i32_0 : i32, i32
  }
  func.func @transform_4(%arg0: i32) -> (i32, i32) {
    %c0_i32 = arith.constant 0 : i32
    %c0_i32_0 = arith.constant 0 : i32
    %c0_i32_1 = arith.constant 0 : i32
    return %c0_i32, %c0_i32_0 : i32, i32
  }
  func.func @transform_5(%arg0: i32) -> (i32, i32, i32) {
    %c0_i32 = arith.constant 0 : i32
    %c0_i32_0 = arith.constant 0 : i32
    %c0_i32_1 = arith.constant 0 : i32
    return %arg0, %c0_i32, %c0_i32_0 : i32, i32, i32
  }
  func.func @transform_6(%arg0: i32) -> (i32, i32, i32) {
    %c0_i32 = arith.constant 0 : i32
    %c0_i32_0 = arith.constant 0 : i32
    %c0_i32_1 = arith.constant 0 : i32
    return %arg0, %c0_i32, %c0_i32_0 : i32, i32, i32
  }
}

</mosaic_0001>

<bundles_post_ra>
// kernel: tpu_custom_call.1
= control target key start
LH: loop header
LB: loop body
LE: loop exit
PB: predicated region body
PF: predicated region fallthrough
CT: control target
= control target key end

     0   :  { %12 = vsyncpa [#allocation3], 0  ;;  %s2608_s0 = inlined_call_operand.vmem [shape: f32[8,128,32], index: 0, kind: input, shape index: {}]   ;;  %s2609_s1 = inlined_call_operand.vmem [shape: f32[8,1,32], index: 1, kind: input, shape index: {}]   ;;  %s2610_s2 = inlined_call_operand.vmem [shape: f32[32,32], index: 2, kind: input, shape index: {}]   ;;  %s2611_s3 = inlined_call_operand.vmem [shape: f32[1,32], index: 3, kind: input, shape index: {}]   ;;  %s2612_s4 = inlined_call_operand.vmem [shape: f32[1,32], index: 4, kind: input, shape index: {}]   ;;  %s2613_s5 = inlined_call_operand.hbm [shape: f32[8,1,128], index: 5, kind: output, shape index: {0}]   ;;  %s2614_s6 = inlined_call_operand.hbm [shape: f32[8,1,32], index: 6, kind: output, shape index: {1}]  }
   0x1   :  { %14 = vsyncpa [#allocation3 + $0x1], 0 }
   0x2   :  { %15 = vsyncpa [#allocation5], 0 }
   0x3   :  { %17 = vsyncpa [#allocation5 + $0x1], 0  ;;  %s1988_s21 = smov 0   ;;  %s1990_s22 = smov 0  }
   0x4   :  { %s1992_s23 = smov 0   ;;  %s1994_s24 = smov 0  }
   0x5 LB: > { %s2009_s25 = sadd.s32 4294967295, %s1944_s24   ;;  %s1476_s26 = sadd.s32 4294967294, %s1944_s24   ;;  %s1944_s24 = sphi %s1994_s24, %s2629_s24   ;;  %s1940_s23 = sphi %s1992_s23, %s2628_s23   ;;  %s1936_s22 = sphi %s1990_s22, %s2627_s22   ;;  %s1932_s21 = sphi %s1988_s21, %s2626_s21  }
   0x6   : > { %s2013_s27 = sadd.s32 1, %s1944_s24   ;;  %s145_s28 = sadd.s32 1, %s1940_s23 }
   0x7   : > { %s142_s29 = ssub.s32 %s1944_s24, %s2013_s27  ;;  %p155_p0 = scmp.ne.s32.totalorder %s1940_s23, %s1936_s22 }
   0x8   : > { %p143_p1 = scmp.eq.s32.totalorder %s142_s29, 0  ;;  %p156_p2 = scmp.eq.s32.totalorder %s2009_s25, 3 }
   0x9   : > { %p161_p3 = scmp.ne.s32.totalorder %s1936_s22, %s1932_s21  ;;  %p162_p4 = scmp.eq.s32.totalorder %s1476_s26, 3 }
   0xa   : > { %s2024_s30 = scalar_select %p143_p1, %s1940_s23, %s145_s28  }
   0xb   : > { %p2026_p5 = por %p156_p2, %p155_p0  ;;  %p2030_p6 = por %p162_p4, %p161_p3 }
   0xc   : > { %p1479_p7 = scmp.ge.s32.totalorder %s1944_s24, 1  ;;  %p233_p8 = scmp.lt.s32.totalorder %s1944_s24, 5 }
   0xe   : > { %p234_p9 = pnand %p1479_p7, %p233_p8 }
  0x10   : > { %237 = sbr.rel (%p234_p9) target bundleno = 1034 (0x40a), region = 40 }
  0x15   : > { %v324_v0 = vld [vmem:[%s2610_s2 + $0x18] sm:$0xff]  ;;  %v323_v1 = vld [vmem:[%s2610_s2 + $0x10] sm:$0xff]  ;;  %s1482_s13 = sshll.u32 %s2009_s25, 1  ;;  %v322_v2 = vld [vmem:[%s2610_s2 + $0x8] sm:$0xff]  ;;  %vm325_vm0 = vcmask 261120   ;;  %vm973_vm1 = vcmask 130112  }
  0x16   : > { %1605 = vmatprep.subr.mxu0 %v324_v0  ;;  %p274_p10 = scmp.lt.s32.totalorder %s1482_s13, 7  ;;  %v321_v3 = vld [vmem:[%s2610_s2] sm:$0xff]  ;;  %vm980_vm2 = vcmask 195712   ;;  %vm987_vm3 = vcmask 261312   ;;  %vm994_vm4 = vcmask 326912   ;;  %vm1001_vm5 = vcmask 392512  }
  0x17   : > { %1606 = vmatpush3.msra.mxu0 %v324_v0  ;;  %v2208_v36 = vld [vmem:[%s2611_s3] ss:$0 sm:$0xff]  ;;  %vm1008_vm6 = vcmask 458112   ;;  %vm1015_vm7 = vcmask 523712   ;;  %vm1022_vm8 = vcmask 589312   ;;  %vm1029_vm9 = vcmask 654912  }
  0x18   : > { %1607 = vmatprep.subr.mxu0 %v323_v1  ;;  %s2631_s13 = smov (!%p274_p10, %s1482_s13), 7  ;;  %v2228_v59 = vld [vmem:[%s2612_s4] ss:$0 sm:$0xff]  ;;  %vm1036_vm10 = vcmask 720512   ;;  %vm1043_vm11 = vcmask 786112   ;;  %vm1050_vm12 = vcmask 851712  }
  0x19   : > { %1608 = vmatpush3.msra.mxu0 %v323_v1  ;;  %s1532_s18 = sshll.u32 %s2631_s13, 7  ;;  %s2203_s9 = scalar_lea.vmem %s2609_s1, %s2631_s13  ;;  %vm1057_vm13 = vcmask 917312   ;;  %vm1064_vm14 = vcmask 982912   ;;  %vm1071_vm15 = vcmask 1048512  }
  0x1a   : > { %1609 = vmatprep.subr.mxu0 %v322_v2  ;;  %s2055_s26 = scalar_lea.vmem %s2608_s0, %s1532_s18  ;;  %v2211_v37 = vld [vmem:[%s2203_s9] ss:$0 sm:$0xff]  ;;  %s2476_s14 = sand.u32 1, %s1936_s22  }
  0x1b   : > { %1610 = vmatpush3.msra.mxu0 %v322_v2  ;;  %v2058_v4 = vld [vmem:[%s2055_s26] sm:$0xff]  ;;  %v2061_v5 = vld [vmem:[%s2055_s26 + $0x8] sm:$0xff]  ;;  %v2064_v6 = vld [vmem:[%s2055_s26 + $0x10] sm:$0xff]  ;;  %s1480_s15 = sshll.u32 %s2476_s14, 1  ;;  %s1533_s18 = sshll.u32 %s2009_s25, 5 }
  0x1c   : > { %1611 = vmatprep.subr.mxu0 %v321_v3  ;;  %1613 = vmatprep.mubr.msk.f32.mxu0 %vm325_vm0, %v2058_v4  ;;  %v2073_v7 = vld [vmem:[%s2055_s26 + $0x18] sm:$0xff]  ;;  %v2076_v8 = vld [vmem:[%s2055_s26 + $0x20] sm:$0xff]  ;;  %v2083_v9 = vld [vmem:[%s2055_s26 + $0x28] sm:$0xff]  ;;  %s2482_s16 = scalar_lea.vmem [#allocation2], %s1480_s15  ;;  %s2528_s28 = scalar_lea.hbm %s2613_s5, %s1533_s18 }
  0x1d   : > { %1612 = vmatpush3.msra.mxu0 %v321_v3  ;;  %v2086_v10 = vld [vmem:[%s2055_s26 + $0x30] sm:$0xff]  ;;  %v2093_v11 = vld [vmem:[%s2055_s26 + $0x38] sm:$0xff]  ;;  %v2096_v12 = vld [vmem:[%s2055_s26 + $0x40] sm:$0xff]  ;;  %s1357_s17 = sshll.u32 %s2482_s16, 4  ;;  %s1339_s29 = scalar_lea.sflag [#allocation3], %s2476_s14  ;;  %s2520_s17 = int_to_ptr.vmem [resolvable:$true] %s1357_s17 }
  0x1e   : > { %1614 = vmatmul.mubr.msk.f32.vlgmr.msra.gmra.mxu0 %vm325_vm0, %v2061_v5  ;;  %v2103_v13 = vld [vmem:[%s2055_s26 + $0x48] sm:$0xff]  ;;  %v2106_v14 = vld [vmem:[%s2055_s26 + $0x50] sm:$0xff]  ;;  %v2113_v15 = vld [vmem:[%s2055_s26 + $0x58] sm:$0xff] }
  0x1f   : > { %1616 = vmatprep.mubr.msk.f32.mxu0 %vm325_vm0, %v2064_v6  ;;  %v2116_v16 = vld [vmem:[%s2055_s26 + $0x60] sm:$0xff]  ;;  %v2123_v17 = vld [vmem:[%s2055_s26 + $0x68] sm:$0xff]  ;;  %v2126_v18 = vld [vmem:[%s2055_s26 + $0x70] sm:$0xff] }
  0x20   : > { %v2133_v19 = vld [vmem:[%s2055_s26 + $0x78] sm:$0xff]  ;;  %v303_v20 = vld [vmem:[%s2055_s26 + $0x80] sm:$0xff]  ;;  %v304_v21 = vld [vmem:[%s2055_s26 + $0x88] sm:$0xff] }
  0x21   : > { %v305_v22 = vld [vmem:[%s2055_s26 + $0x90] sm:$0xff]  ;;  %v306_v23 = vld [vmem:[%s2055_s26 + $0x98] sm:$0xff]  ;;  %v307_v24 = vld [vmem:[%s2055_s26 + $0xa0] sm:$0xff] }
  0x22   : > { %1617 = vmatmul.mubr.msk.f32.gmra.mxu0 %vm325_vm0, %v2073_v7  ;;  %v308_v25 = vld [vmem:[%s2055_s26 + $0xa8] sm:$0xff]  ;;  %v2149_v26 = vld [vmem:[%s2055_s26 + $0xb0] sm:$0xff]  ;;  %v2155_v27 = vld [vmem:[%s2055_s26 + $0xb8] sm:$0xff] }
  0x23   : > { %1619 = vmatprep.mubr.msk.f32.mxu0 %vm325_vm0, %v2076_v8  ;;  %2620 = vst [vmem:[#allocation8_spill] sm:$0xff] %v2149_v26  ;;  %2621 = vst [vmem:[#allocation9_spill] sm:$0xff] %v2155_v27  ;;  %v2158_v28 = vld [vmem:[%s2055_s26 + $0xc0] sm:$0xff]  ;;  %v2165_v29 = vld [vmem:[%s2055_s26 + $0xc8] sm:$0xff] }
  0x24   : > { %2622 = vst [vmem:[#allocation10_spill] sm:$0xff] %v2158_v28  ;;  %v2168_v30 = vld [vmem:[%s2055_s26 + $0xd0] sm:$0xff]  ;;  %v2175_v31 = vld [vmem:[%s2055_s26 + $0xd8] sm:$0xff]  ;;  %v2178_v32 = vld [vmem:[%s2055_s26 + $0xe0] sm:$0xff] }
  0x25   : > { %v2185_v33 = vld [vmem:[%s2055_s26 + $0xe8] sm:$0xff]  ;;  %v2188_v34 = vld [vmem:[%s2055_s26 + $0xf0] sm:$0xff]  ;;  %v2195_v35 = vld [vmem:[%s2055_s26 + $0xf8] sm:$0xff] }
  0x26   : > { %1620 = vmatmul.mubr.msk.f32.gmra.mxu0 %vm325_vm0, %v2083_v9 }
  0x27   : > { %1622 = vmatprep.mubr.msk.f32.mxu0 %vm325_vm0, %v2086_v10 }
  0x2a   : > { %1623 = vmatmul.mubr.msk.f32.gmra.mxu0 %vm325_vm0, %v2093_v11 }
  0x2b   : > { %1625 = vmatprep.mubr.msk.f32.mxu0 %vm325_vm0, %v2096_v12 }
  0x2e   : > { %1626 = vmatmul.mubr.msk.f32.gmra.mxu0 %vm325_vm0, %v2103_v13 }
  0x2f   : > { %1628 = vmatprep.mubr.msk.f32.mxu0 %vm325_vm0, %v2106_v14 }
  0x32   : > { %1629 = vmatmul.mubr.msk.f32.gmra.mxu0 %vm325_vm0, %v2113_v15 }
  0x33   : > { %1631 = vmatprep.mubr.msk.f32.mxu0 %vm325_vm0, %v2116_v16 }
  0x36   : > { %1632 = vmatmul.mubr.msk.f32.gmra.mxu0 %vm325_vm0, %v2123_v17 }
  0x37   : > { %1634 = vmatprep.mubr.msk.f32.mxu0 %vm325_vm0, %v2126_v18 }
  0x3a   : > { %1635 = vmatmul.mubr.msk.f32.gmra.mxu0 %vm325_vm0, %v2133_v19 }
  0x3b   : > { %1637 = vmatprep.mubr.msk.f32.mxu0 %vm325_vm0, %v303_v20 }
  0x3e   : > { %1638 = vmatmul.mubr.msk.f32.gmra.mxu0 %vm325_vm0, %v304_v21 }
  0x3f   : > { %1640 = vmatprep.mubr.msk.f32.mxu0 %vm325_vm0, %v305_v22 }
  0x42   : > { %1641 = vmatmul.mubr.msk.f32.gmra.mxu0 %vm325_vm0, %v306_v23 }
  0x43   : > { %1643 = vmatprep.mubr.msk.f32.mxu0 %vm325_vm0, %v307_v24 }
  0x46   : > { %1644 = vmatmul.mubr.msk.f32.gmra.mxu0 %vm325_vm0, %v308_v25 }
  0x47   : > { %1646 = vmatprep.mubr.msk.f32.mxu0 %vm325_vm0, %v2149_v26 }
  0x4a   : > { %1647 = vmatmul.mubr.msk.f32.gmra.mxu0 %vm325_vm0, %v2155_v27 }
  0x4b   : > { %1649 = vmatprep.mubr.msk.f32.mxu0 %vm325_vm0, %v2158_v28 }
  0x4e   : > { %1650 = vmatmul.mubr.msk.f32.gmra.mxu0 %vm325_vm0, %v2165_v29 }
  0x4f   : > { %1652 = vmatprep.mubr.msk.f32.mxu0 %vm325_vm0, %v2168_v30 }
  0x52   : > { %1653 = vmatmul.mubr.msk.f32.gmra.mxu0 %vm325_vm0, %v2175_v31 }
  0x53   : > { %1655 = vmatprep.mubr.msk.f32.mxu0 %vm325_vm0, %v2178_v32 }
  0x56   : > { %1656 = vmatmul.mubr.msk.f32.gmra.mxu0 %vm325_vm0, %v2185_v33 }
  0x57   : > { %1658 = vmatprep.mubr.msk.f32.mxu0 %vm325_vm0, %v2188_v34 }
  0x5a   : > { %1659 = vmatmul.mubr.msk.f32.gmra.mxu0 %vm325_vm0, %v2195_v35 }
  0xde   : > { %v1615_v38 = vpop.f32.mrf.mxu0 }
  0xdf   : > { %v655_v39 = vadd.f32 %v1615_v38, %v2208_v36 }
  0xe0   : > { %v488_v40 = vpop.f32.mrf.mxu0 }
  0xe1   : > { %v699_v41 = vadd.f32 %v2211_v37, %v655_v39  ;;  %v654_v42 = vadd.f32 %v2208_v36, %v488_v40 }
  0xe2   : > { %v1618_v43 = vpop.f32.mrf.mxu0 }
  0xe3   : > { %1780 = vtanh.f32 %v699_v41  ;;  %v698_v44 = vadd.f32 %v2211_v37, %v654_v42  ;;  %v657_v45 = vadd.f32 %v1618_v43, %v2208_v36 }
  0xe4   : > { %v498_v46 = vpop.f32.mrf.mxu0 }
  0xe5   : > { %1782 = vtanh.f32 %v698_v44  ;;  %v701_v47 = vadd.f32 %v2211_v37, %v657_v45  ;;  %v656_v48 = vadd.f32 %v2208_v36, %v498_v46 }
  0xe6   : > { %v1621_v49 = vpop.f32.mrf.mxu0 }
  0xe7   : > { %1784 = vtanh.f32 %v701_v47  ;;  %v700_v50 = vadd.f32 %v2211_v37, %v656_v48  ;;  %v659_v51 = vadd.f32 %v1621_v49, %v2208_v36 }
  0xe8   : > { %v508_v52 = vpop.f32.mrf.mxu0 }
  0xe9   : > { %v703_v53 = vadd.f32 %v2211_v37, %v659_v51  ;;  %1786 = vtanh.f32 %v700_v50  ;;  %v658_v55 = vadd.f32 %v2208_v36, %v508_v52  ;;  %v2247_v52 = vld [vmem:[%s2203_s9 + $0x1] ss:$0 sm:$0xff]  ;;  %s1854_s9 = scalar_lea.vmem %s2520_s17, 32 }
  0xea   : > { %v1624_v54 = vpop.f32.mrf.mxu0  ;;  %p1855_p11 = scmp.ne.s32.totalorder %s2520_s17, %s1854_s9 }
  0xeb   : > { %1788 = vtanh.f32 %v703_v53  ;;  %v661_v57 = vadd.f32 %v1624_v54, %v2208_v36  ;;  %v702_v60 = vadd.f32 %v2211_v37, %v658_v55 }
  0xec   : > { %v518_v56 = vpop.f32.mrf.mxu0  ;;  %p1856_p12 = pnand %p1855_p11, %p2026_p5 }
  0xed   : > { %v705_v1 = vadd.f32 %v2211_v37, %v661_v57  ;;  %1790 = vtanh.f32 %v702_v60  ;;  %v660_v3 = vadd.f32 %v2208_v36, %v518_v56 }
  0xee   : > { %v1627_v58 = vpop.f32.mrf.mxu0  ;;  %p1857_p13 = pneg %p1856_p12 }
  0xef   : > { %1792 = vtanh.f32 %v705_v1  ;;  %v663_v24 = vadd.f32 %v1627_v58, %v2208_v36  ;;  %v704_v38 = vadd.f32 %v2211_v37, %v660_v3 }
  0xf0   : > { %v1781_v61 = vpop.eup %1780  ;;  %v528_v62 = vpop.f32.mrf.mxu0 }
  0xf1   : > { %v770_v63 = vmul.f32 %v1781_v61, %v2228_v59  ;;  %v707_v43 = vadd.f32 %v2211_v37, %v663_v24  ;;  %v662_v44 = vadd.f32 %v2208_v36, %v528_v62  ;;  %1794 = vtanh.f32 %v704_v38 }
  0xf2   : > { %v1783_v0 = vpop.eup %1782  ;;  %v1630_v2 = vpop.f32.mrf.mxu0 }
  0xf3   : > { %v804_v20 = vsel %vm325_vm0, %v770_v63, 0.0  ;;  %v769_v23 = vmul.f32 %v1783_v0, %v2228_v59  ;;  %v665_v49 = vadd.f32 %v1630_v2, %v2208_v36  ;;  %1796 = vtanh.f32 %v707_v43 }
  0xf4   : > { %v1785_v21 = vpop.eup %1784  ;;  %805 = vadd.xlane.f32.xlu0 %v804_v20  ;;  %v538_v22 = vpop.f32.mrf.mxu0  ;;  %v706_v51 = vadd.f32 %v2211_v37, %v662_v44 }
  0xf5   : > { %v801_v39 = vsel %vm325_vm0, %v769_v23, 0.0  ;;  %v772_v40 = vmul.f32 %v1785_v21, %v2228_v59  ;;  %v709_v58 = vadd.f32 %v2211_v37, %v665_v49  ;;  %v664_v63 = vadd.f32 %v2208_v36, %v538_v22 }
  0xf6   : > { %v1633_v25 = vpop.f32.mrf.mxu0  ;;  %v1787_v41 = vpop.eup %1786  ;;  %1798 = vtanh.f32 %v706_v51 }
  0xf7   : > { %v810_v47 = vsel %vm325_vm0, %v772_v40, 0.0  ;;  %v771_v48 = vmul.f32 %v1787_v41, %v2228_v59  ;;  %v708_v22 = vadd.f32 %v2211_v37, %v664_v63 }
  0xf8   : > { %802 = vadd.xlane.f32.xlu0 %v801_v39  ;;  %v548_v42 = vpop.f32.mrf.mxu0  ;;  %v1789_v46 = vpop.eup %1788  ;;  %v667_v39 = vadd.f32 %v1633_v25, %v2208_v36 }
  0xf9   : > { %v774_v54 = vmul.f32 %v1789_v46, %v2228_v59  ;;  %v807_v56 = vsel %vm325_vm0, %v771_v48, 0.0  ;;  %v666_v40 = vadd.f32 %v2208_v36, %v548_v42 }
  0xfa   : > { %v1636_v45 = vpop.f32.mrf.mxu0  ;;  %v1791_v57 = vpop.eup %1790  ;;  %v711_v25 = vadd.f32 %v2211_v37, %v667_v39 }
  0xfb   : > { %v816_v0 = vsel %vm325_vm0, %v774_v54, 0.0  ;;  %v773_v21 = vmul.f32 %v1791_v57, %v2228_v59  ;;  %v669_v49 = vadd.f32 %v1636_v45, %v2208_v36 }
  0xfc   : > { %811 = vadd.xlane.f32.xlu0 %v810_v47  ;;  %v558_v50 = vpop.f32.mrf.mxu0  ;;  %v1793_v2 = vpop.eup %1792 }
  0xfd   : > { %v776_v41 = vmul.f32 %v1793_v2, %v2228_v59  ;;  %v813_v46 = vsel %vm325_vm0, %v773_v21, 0.0  ;;  %v713_v45 = vadd.f32 %v2211_v37, %v669_v49 }
  0xfe   : > { %v1639_v53 = vpop.f32.mrf.mxu0  ;;  %v1795_v48 = vpop.eup %1794 }
  0xff   : > { %v671_v55 = vadd.f32 %v1639_v53, %v2208_v36  ;;  %v822_v57 = vsel %vm325_vm0, %v776_v41, 0.0 }
 0x100   : > { %808 = vadd.xlane.f32.xlu0 %v807_v56  ;;  %v568_v60 = vpop.f32.mrf.mxu0  ;;  %v710_v56 = vadd.f32 %v2211_v37, %v666_v40 }
 0x101   : > { %v715_v61 = vadd.f32 %v2247_v52, %v671_v55  ;;  %v670_v62 = vadd.f32 %v2208_v36, %v568_v60  ;;  %v1797_v55 = vpop.eup %1796 }
 0x102   : > { %v1642_v1 = vpop.f32.mrf.mxu0 }
 0x103   : > { %1800 = vtanh.f32 %v715_v61  ;;  %v714_v3 = vadd.f32 %v2247_v52, %v670_v62  ;;  %v673_v20 = vadd.f32 %v1642_v1, %v2208_v36  ;;  %v668_v62 = vadd.f32 %v2208_v36, %v558_v50  ;;  %v1799_v2 = vpop.eup %1798 }
 0x104   : > { %1802 = vtanh.f32 %v709_v58  ;;  %817 = vadd.xlane.f32.xlu0 %v816_v0  ;;  %v578_v23 = vpop.f32.mrf.mxu0  ;;  %v775_v58 = vmul.f32 %v1795_v48, %v2228_v59  ;;  %v778_v0 = vmul.f32 %v1797_v55, %v2228_v59 }
 0x105   : > { %1804 = vtanh.f32 %v714_v3  ;;  %v717_v24 = vadd.f32 %v2247_v52, %v673_v20  ;;  %v672_v38 = vadd.f32 %v2208_v36, %v578_v23 }
 0x106   : > { %v1645_v43 = vpop.f32.mrf.mxu0  ;;  %v819_v3 = vsel %vm325_vm0, %v775_v58, 0.0 }
 0x107   : > { %1806 = vtanh.f32 %v717_v24  ;;  %v716_v44 = vadd.f32 %v2247_v52, %v672_v38  ;;  %v675_v47 = vadd.f32 %v1645_v43, %v2208_v36  ;;  %v712_v38 = vadd.f32 %v2211_v37, %v668_v62 }
 0x108   : > { %814 = vadd.xlane.f32.xlu0 %v813_v46  ;;  %v588_v51 = vpop.f32.mrf.mxu0  ;;  %1808 = vtanh.f32 %v708_v22  ;;  %v828_v43 = vsel %vm325_vm0, %v778_v0, 0.0  ;;  %v777_v46 = vmul.f32 %v1799_v2, %v2228_v59 }
 0x109   : > { %v719_v53 = vadd.f32 %v2247_v52, %v675_v47  ;;  %v674_v42 = vadd.f32 %v2208_v36, %v588_v51  ;;  %1810 = vtanh.f32 %v716_v44 }
 0x10a   : > { %v1648_v54 = vpop.f32.mrf.mxu0 }
 0x10b   : > { %v677_v60 = vadd.f32 %v1648_v54, %v2208_v36  ;;  %1812 = vtanh.f32 %v719_v53  ;;  %v718_v63 = vadd.f32 %v2247_v52, %v674_v42 }
 0x10c   : > { %823 = vadd.xlane.f32.xlu0 %v822_v57  ;;  %v598_v61 = vpop.f32.mrf.mxu0  ;;  %1814 = vtanh.f32 %v711_v25 }
 0x10d   : > { %1816 = vtanh.f32 %v710_v56  ;;  %v721_v23 = vadd.f32 %v2247_v52, %v677_v60  ;;  %v676_v44 = vadd.f32 %v2208_v36, %v598_v61  ;;  %v825_v60 = vsel %vm325_vm0, %v777_v46, 0.0 }
 0x10e   : > { %v1651_v1 = vpop.f32.mrf.mxu0  ;;  %1818 = vtanh.f32 %v713_v45 }
 0x10f   : > { %v679_v20 = vadd.f32 %v1651_v1, %v2208_v36  ;;  %1820 = vtanh.f32 %v718_v63  ;;  %v720_v55 = vadd.f32 %v2247_v52, %v676_v44 }
 0x110   : > { %v1801_v21 = vpop.eup %1800  ;;  %820 = vadd.xlane.f32.xlu0 %v819_v3  ;;  %v608_v24 = vpop.f32.mrf.mxu0 }
 0x111   : > { %v1803_v50 = vpop.eup %1802  ;;  %v786_v22 = vmul.f32 %v1801_v21, %v2228_v59  ;;  %v723_v39 = vadd.f32 %v2247_v52, %v679_v20  ;;  %v678_v40 = vadd.f32 %v2208_v36, %v608_v24 }
 0x112   : > { %v1805_v41 = vpop.eup %1804  ;;  %v1654_v47 = vpop.f32.mrf.mxu0  ;;  %v780_v56 = vmul.f32 %v1803_v50, %v2228_v59 }
 0x113   : > { %v852_v48 = vsel %vm325_vm0, %v786_v22, 0.0  ;;  %v785_v49 = vmul.f32 %v1805_v41, %v2228_v59  ;;  %1822 = vtanh.f32 %v723_v39  ;;  %v722_v37 = vadd.f32 %v2247_v52, %v678_v40 }
 0x114   : > { %v1807_v51 = vpop.eup %1806  ;;  %829 = vadd.xlane.f32.xlu0 %v828_v43  ;;  %853 = vadd.xlane.f32.xlu1 %v852_v48  ;;  %1824 = vtanh.f32 %v721_v23  ;;  %v681_v53 = vadd.f32 %v1654_v47, %v2208_v36  ;;  %v618_v25 = vpop.f32.mrf.mxu0  ;;  %v834_v21 = vsel %vm325_vm0, %v780_v56, 0.0 }
 0x115   : > { %v788_v42 = vmul.f32 %v1807_v51, %v2228_v59  ;;  %1826 = vtanh.f32 %v722_v37  ;;  %v680_v54 = vadd.f32 %v2208_v36, %v618_v25  ;;  %v1809_v45 = vpop.eup %1808  ;;  %v849_v61 = vsel %vm325_vm0, %v785_v49, 0.0 }
 0x116   : > { %1828 = vtanh.f32 %v712_v38  ;;  %v725_v57 = vadd.f32 %v2247_v52, %v681_v53  ;;  %v1657_v58 = vpop.f32.mrf.mxu0  ;;  %v1811_v0 = vpop.eup %1810  ;;  %v779_v38 = vmul.f32 %v1809_v45, %v2228_v59 }
 0x117   : > { %v724_v62 = vadd.f32 %v2247_v52, %v680_v54  ;;  %v683_v63 = vadd.f32 %v1657_v58, %v2208_v36  ;;  %v858_v2 = vsel %vm325_vm0, %v788_v42, 0.0  ;;  %v787_v22 = vmul.f32 %v1811_v0, %v2228_v59 }
 0x118   : > { %826 = vadd.xlane.f32.xlu0 %v825_v60  ;;  %850 = vadd.xlane.f32.xlu1 %v849_v61  ;;  %1830 = vtanh.f32 %v725_v57  ;;  %v628_v1 = vpop.f32.mrf.mxu0  ;;  %v1813_v20 = vpop.eup %1812  ;;  %v831_v51 = vsel %vm325_vm0, %v779_v38, 0.0 }
 0x119   : > { %1832 = vtanh.f32 %v724_v62  ;;  %v727_v3 = vadd.f32 %v2247_v52, %v683_v63  ;;  %v682_v23 = vadd.f32 %v2208_v36, %v628_v1  ;;  %v1815_v50 = vpop.eup %1814  ;;  %v790_v46 = vmul.f32 %v1813_v20, %v2228_v59 }
 0x11a   : > { %1834 = vtanh.f32 %v720_v55  ;;  %v1660_v24 = vpop.f32.mrf.mxu0  ;;  %v1817_v40 = vpop.eup %1816  ;;  %v782_v49 = vmul.f32 %v1815_v50, %v2228_v59  ;;  %v855_v53 = vsel %vm325_vm0, %v787_v22, 0.0 }
 0x11b   : > { %1836 = vtanh.f32 %v727_v3  ;;  %v685_v39 = vadd.f32 %v1660_v24, %v2208_v36  ;;  %v726_v41 = vadd.f32 %v2247_v52, %v682_v23  ;;  %v1819_v44 = vpop.eup %1818  ;;  %v864_v55 = vsel %vm325_vm0, %v790_v46, 0.0 }
 0x11c   : > { %835 = vadd.xlane.f32.xlu0 %v834_v21  ;;  %859 = vadd.xlane.f32.xlu1 %v858_v2  ;;  %v638_v43 = vpop.f32.mrf.mxu0  ;;  %v1821_v37 = vpop.eup %1820  ;;  %v840_v58 = vsel %vm325_vm0, %v782_v49, 0.0  ;;  %v781_v45 = vmul.f32 %v1817_v40, %v2228_v59 }
 0x11d   : > { %v729_v47 = vadd.f32 %v2247_v52, %v685_v39  ;;  %v684_v48 = vadd.f32 %v2208_v36, %v638_v43  ;;  %1838 = vtanh.f32 %v726_v41  ;;  %v789_v60 = vmul.f32 %v1821_v37, %v2228_v59 }
 0x11e   : > { %v837_v2 = vsel %vm325_vm0, %v781_v45, 0.0  ;;  %v784_v39 = vmul.f32 %v1819_v44, %v2228_v59 }
 0x11f   : > { %1840 = vtanh.f32 %v729_v47  ;;  %v728_v25 = vadd.f32 %v2247_v52, %v684_v48  ;;  %v861_v3 = vsel %vm325_vm0, %v789_v60, 0.0 }
 0x120   : > { %v1823_v42 = vpop.eup %1822  ;;  %832 = vadd.xlane.f32.xlu0 %v831_v51  ;;  %856 = vadd.xlane.f32.xlu1 %v855_v53  ;;  %v846_v48 = vsel %vm325_vm0, %v784_v39, 0.0 }
 0x121   : > { %v1825_v54 = vpop.eup %1824  ;;  %v794_v56 = vmul.f32 %v1823_v42, %v2228_v59  ;;  %1842 = vtanh.f32 %v728_v25 }
 0x122   : > { %v1827_v36 = vpop.eup %1826  ;;  %v792_v62 = vmul.f32 %v1825_v54, %v2228_v59 }
 0x123   : > { %v1829_v57 = vpop.eup %1828  ;;  %v793_v61 = vmul.f32 %v1827_v36, %v2228_v59  ;;  %v876_v44 = vsel %vm325_vm0, %v794_v56, 0.0 }
 0x124   : > { %841 = vadd.xlane.f32.xlu0 %v840_v58  ;;  %865 = vadd.xlane.f32.xlu1 %v864_v55  ;;  %v783_v20 = vmul.f32 %v1829_v57, %v2228_v59  ;;  %v870_v24 = vsel %vm325_vm0, %v792_v62, 0.0 }
 0x125   : > { %v1831_v52 = vpop.eup %1830  ;;  %v873_v51 = vsel %vm325_vm0, %v793_v61, 0.0 }
 0x126   : > { %v1833_v63 = vpop.eup %1832  ;;  %v796_v0 = vmul.f32 %v1831_v52, %v2228_v59  ;;  %v843_v22 = vsel %vm325_vm0, %v783_v20, 0.0  ;;  %v929_v20 = vlaneseq }
 0x127   : > { %v1835_v1 = vpop.eup %1834  ;;  %v795_v21 = vmul.f32 %v1833_v63, %v2228_v59 }
 0x128   : > { %v1837_v23 = vpop.eup %1836  ;;  %838 = vadd.xlane.f32.xlu0 %v837_v2  ;;  %862 = vadd.xlane.f32.xlu1 %v861_v3  ;;  %v791_v40 = vmul.f32 %v1835_v1, %v2228_v59  ;;  %v882_v53 = vsel %vm325_vm0, %v796_v0, 0.0  ;;  %v2370_v39 = vshrl.u32 %v929_v20, 7 }
 0x129   : > { %v798_v50 = vmul.f32 %v1837_v23, %v2228_v59  ;;  %v879_v25 = vsel %vm325_vm0, %v795_v21, 0.0 }
 0x12a   : > { %v1839_v38 = vpop.eup %1838  ;;  %v867_v49 = vsel %vm325_vm0, %v791_v40, 0.0 }
 0x12b   : > { %v797_v43 = vmul.f32 %v1839_v38, %v2228_v59  ;;  %v888_v42 = vsel %vm325_vm0, %v798_v50, 0.0 }
 0x12c   : > { %v1841_v41 = vpop.eup %1840  ;;  %844 = vadd.xlane.f32.xlu0 %v843_v22  ;;  %871 = vadd.xlane.f32.xlu1 %v870_v24  ;;  %v2363_v24 = vand.u32 127, %v929_v20 }
 0x12d   : > { %v800_v46 = vmul.f32 %v1841_v41, %v2228_v59  ;;  %v885_v54 = vsel %vm325_vm0, %v797_v43, 0.0 }
 0x12e   : > { %v1843_v47 = vpop.eup %1842  ;;  %v975_v38 = vadd.s32 4294967280, %v2363_v24  ;;  %v968_v40 = vadd.s32 4294967288, %v2363_v24  ;;  %v966_v43 = vsub.s32 %v2363_v24, %v2370_v39  ;;  %v1010_v26 = vadd.s32 4294967240, %v2363_v24 }
 0x12f   : > { %v799_v37 = vmul.f32 %v1843_v47, %v2228_v59  ;;  %v894_v55 = vsel %vm325_vm0, %v800_v46, 0.0  ;;  %v982_v46 = vadd.s32 4294967272, %v2363_v24 }
 0x130   : > { %847 = vadd.xlane.f32.xlu0 %v846_v48  ;;  %868 = vadd.xlane.f32.xlu1 %v867_v49  ;;  %v978_v47 = vsub.s32 %v975_v38, %v2370_v39  ;;  %v989_v48 = vadd.s32 4294967264, %v2363_v24  ;;  %v971_v49 = vsub.s32 %v968_v40, %v2370_v39  ;;  %v996_v38 = vadd.s32 4294967256, %v2363_v24 }
 0x131   : > { %v891_v59 = vsel %vm325_vm0, %v799_v37, 0.0  ;;  %vm1152_vm0 = vcmask 1041409  }
 0x134   : > { %877 = vadd.xlane.f32.xlu1 %v876_v44 }
 0x138   : > { %874 = vadd.xlane.f32.xlu1 %v873_v51 }
 0x13c   : > { %883 = vadd.xlane.f32.xlu1 %v882_v53  ;;  %v1003_v53 = vadd.s32 4294967248, %v2363_v24 }
 0x13e   : > { %v1006_v28 = vsub.s32 %v1003_v53, %v2370_v39 }
 0x140   : > { %880 = vadd.xlane.f32.xlu1 %v879_v25 }
 0x144   : > { %889 = vadd.xlane.f32.xlu1 %v888_v42  ;;  %v985_v42 = vsub.s32 %v982_v46, %v2370_v39 }
 0x148   : > { %886 = vadd.xlane.f32.xlu1 %v885_v54 }
 0x14c   : > { %892 = vadd.xlane.f32.xlu1 %v891_v59  ;;  %v992_v59 = vsub.s32 %v989_v48, %v2370_v39  ;;  %v999_v48 = vsub.s32 %v996_v38, %v2370_v39  ;;  %v1038_v38 = vadd.s32 4294967208, %v2363_v24 }
 0x150   : > { %895 = vadd.xlane.f32.xlu1 %v894_v55 }
 0x17d   : > { %v806_v56 = vpop.xlane.xlu0 %805 }
 0x17e   : > { %v972_v20 = vrot.slane %v806_v56, %v971_v49 }
 0x181   : > { %v803_v36 = vpop.xlane.xlu0 %802 }
 0x182   : > { %v967_v51 = vrot.slane %v803_v36, %v966_v43 }
 0x184   : > { %v974_v36 = vsel %vm973_vm1, %v972_v20, %v967_v51  ;;  %v1013_v51 = vsub.s32 %v1010_v26, %v2370_v39  ;;  %v1024_v26 = vadd.s32 4294967224, %v2363_v24 }
 0x185   : > { %v812_v57 = vpop.xlane.xlu0 %811 }
 0x189   : > { %v809_v58 = vpop.xlane.xlu0 %808 }
 0x18a   : > { %v979_v54 = vrot.slane %v809_v58, %v978_v47 }
 0x18d   : > { %v2349_v45 = vpop.xlane.xlu0 %817 }
 0x191   : > { %v2351_v60 = vpop.xlane.xlu0 %814 }
 0x195   : > { %v2353_v52 = vpop.xlane.xlu0 %823 }
 0x199   : > { %v2355_v63 = vpop.xlane.xlu0 %820 }
 0x19d   : > { %v854_v61 = vpop.xlane.xlu1 %853  ;;  %v2357_v2 = vpop.xlane.xlu0 %829 }
 0x19e   : > { %v1080_v40 = vrot.slane %v854_v61, %v971_v49  ;;  %v986_v61 = vrot.slane %v812_v57, %v985_v42  ;;  %v1007_v57 = vrot.slane %v2355_v63, %v1006_v28  ;;  %v1045_v63 = vadd.s32 4294967200, %v2363_v24 }
 0x1a1   : > { %v851_v62 = vpop.xlane.xlu1 %850  ;;  %v2361_v21 = vpop.xlane.xlu0 %826 }
 0x1a2   : > { %v1076_v25 = vrot.slane %v851_v62, %v966_v43  ;;  %v1017_v62 = vadd.s32 4294967232, %v2363_v24  ;;  %v981_v43 = vsel %vm980_vm2, %v979_v54, %v974_v36 }
 0x1a3   : > { %v988_v20 = vsel %vm987_vm3, %v986_v61, %v981_v43  ;;  %v1041_v61 = vsub.s32 %v1038_v38, %v2370_v39 }
 0x1a4   : > { %v1081_v58 = vsel %vm973_vm1, %v1080_v40, %v1076_v25  ;;  %v1020_v25 = vsub.s32 %v1017_v62, %v2370_v39  ;;  %vm931_vm1 = vcmp.lt.s32.totalorder %v2363_v24, 16 }
 0x1a5   : > { %v860_v0 = vpop.xlane.xlu1 %859  ;;  %v2368_v22 = vpop.xlane.xlu0 %835 }
 0x1a6   : > { %v1090_v49 = vrot.slane %v860_v0, %v985_v42  ;;  %v1000_v0 = vrot.slane %v2349_v45, %v999_v48  ;;  %v1021_v45 = vrot.slane %v2361_v21, %v1020_v25  ;;  %v1059_v21 = vadd.s32 4294967184, %v2363_v24 }
 0x1a9   : > { %v857_v1 = vpop.xlane.xlu1 %856  ;;  %v2381_v37 = vpop.xlane.xlu0 %832 }
 0x1aa   : > { %v1085_v55 = vrot.slane %v857_v1, %v978_v47  ;;  %v993_v1 = vrot.slane %v2351_v60, %v992_v59  ;;  %v1031_v60 = vadd.s32 4294967216, %v2363_v24 }
 0x1ac   : > { %v1086_v56 = vsel %vm980_vm2, %v1085_v55, %v1081_v58  ;;  %v995_v55 = vsel %vm994_vm4, %v993_v1, %v988_v20  ;;  %v1034_v58 = vsub.s32 %v1031_v60, %v2370_v39  ;;  %v1048_v60 = vsub.s32 %v1045_v63, %v2370_v39 }
 0x1ad   : > { %v2359_v3 = vpop.xlane.xlu1 %865  ;;  %v2395_v46 = vpop.xlane.xlu0 %841  ;;  %v1091_v54 = vsel %vm987_vm3, %v1090_v49, %v1086_v56  ;;  %v1002_v62 = vsel %vm1001_vm5, %v1000_v0, %v995_v55  ;;  %v1027_v56 = vsub.s32 %v1024_v26, %v2370_v39  ;;  %vm1156_vm2 = vcmask 1041408  }
 0x1ae   : > { %v1100_v42 = vrot.slane %v2359_v3, %v999_v48  ;;  %v1014_v3 = vrot.slane %v2353_v52, %v1013_v51  ;;  %v1052_v48 = vadd.s32 4294967192, %v2363_v24  ;;  %vm1947_vm3 = vmmov 0  }
 0x1b1   : > { %v863_v23 = vpop.xlane.xlu1 %862  ;;  %v839_v40 = vpop.xlane.xlu0 %838 }
 0x1b2   : > { %v1095_v47 = vrot.slane %v863_v23, %v992_v59 }
 0x1b4   : > { %v1096_v23 = vsel %vm994_vm4, %v1095_v47, %v1091_v54 }
 0x1b5   : > { %v2365_v50 = vpop.xlane.xlu1 %871  ;;  %v845_v54 = vpop.xlane.xlu0 %844 }
 0x1b6   : > { %v1110_v47 = vrot.slane %v2365_v50, %v1013_v51  ;;  %v1028_v51 = vrot.slane %v2357_v2, %v1027_v56  ;;  %v1042_v2 = vrot.slane %v2368_v22, %v1041_v61 }
 0x1b9   : > { %v2373_v41 = vpop.xlane.xlu1 %868 }
 0x1ba   : > { %v1105_v59 = vrot.slane %v2373_v41, %v1006_v28  ;;  %v1101_v28 = vsel %vm1001_vm5, %v1100_v42, %v1096_v23  ;;  %v1009_v41 = vsel %vm1008_vm6, %v1007_v57, %v1002_v62  ;;  %v1066_v57 = vadd.s32 4294967176, %v2363_v24 }
 0x1bb   : > { %v1016_v20 = vsel %vm1015_vm7, %v1014_v3, %v1009_v41  ;;  %v1062_v42 = vsub.s32 %v1059_v21, %v2370_v39  ;;  %v1049_v62 = vrot.slane %v839_v40, %v1048_v60 }
 0x1bc   : > { %v1106_v43 = vsel %vm1008_vm6, %v1105_v59, %v1101_v28  ;;  %v1023_v52 = vsel %vm1022_vm8, %v1021_v45, %v1016_v20  ;;  %v1055_v59 = vsub.s32 %v1052_v48, %v2370_v39  ;;  %v1069_v63 = vsub.s32 %v1066_v57, %v2370_v39  ;;  %v848_v28 = vpop.xlane.xlu0 %847 }
 0x1bd   : > { %v2383_v44 = vpop.xlane.xlu1 %877  ;;  %v1030_v26 = vsel %vm1029_vm9, %v1028_v51, %v1023_v52  ;;  %v1063_v3 = vrot.slane %v845_v54, %v1062_v42 }
 0x1be   : > { %v1120_v23 = vrot.slane %v2383_v44, %v1027_v56  ;;  %v1056_v40 = vrot.slane %v2395_v46, %v1055_v59  ;;  %v1070_v48 = vrot.slane %v848_v28, %v1069_v63 }
 0x1c1   : > { %v875_v27 = vpop.xlane.xlu1 %874 }
 0x1c2   : > { %v1115_v1 = vrot.slane %v875_v27, %v1020_v25  ;;  %v1111_v27 = vsel %vm1015_vm7, %v1110_v47, %v1106_v43  ;;  %v1035_v25 = vrot.slane %v2381_v37, %v1034_v58 }
 0x1c4   : > { %v1116_v55 = vsel %vm1022_vm8, %v1115_v1, %v1111_v27  ;;  %v1037_v38 = vsel %vm1036_vm10, %v1035_v25, %v1030_v26 }
 0x1c5   : > { %v2399_v53 = vpop.xlane.xlu1 %883  ;;  %v1121_v37 = vsel %vm1029_vm9, %v1120_v23, %v1116_v55  ;;  %v1044_v45 = vsel %vm1043_vm11, %v1042_v2, %v1037_v38 }
 0x1c6   : > { %v1130_v44 = vrot.slane %v2399_v53, %v1041_v61  ;;  %v1051_v1 = vsel %vm1050_vm12, %v1049_v62, %v1044_v45 }
 0x1c9   : > { %v881_v36 = vpop.xlane.xlu1 %880 }
 0x1ca   : > { %v1125_v50 = vrot.slane %v881_v36, %v1034_v58 }
 0x1cc   : > { %v1126_v36 = vsel %vm1036_vm10, %v1125_v50, %v1121_v37  ;;  %v1946_v50 = vmov 0.0  }
 0x1cd   : > { %v890_v49 = vpop.xlane.xlu1 %889  ;;  %v1131_v43 = vsel %vm1043_vm11, %v1130_v44, %v1126_v36  ;;  %1661 = vmatprep.subr.mxu1 %v1946_v50  ;;  %1693 = vmatprep.mubr.msk.f32.mxu1 %vm1947_vm3, %v1946_v50 }
 0x1ce   : > { %v1140_v20 = vrot.slane %v890_v49, %v1055_v59  ;;  %1662 = vmatpush3.msra.mxu1 %v2133_v19  ;;  %v2623_v19 = vld [vmem:[#allocation10_spill] sm:$0xff] }
 0x1cf   : > { %1663 = vmatprep.subr.mxu1 %v1946_v50 }
 0x1d0   : > { %1664 = vmatpush3.msra.mxu1 %v2126_v18 }
 0x1d1   : > { %v887_v0 = vpop.xlane.xlu1 %886  ;;  %1665 = vmatprep.subr.mxu1 %v1946_v50 }
 0x1d2   : > { %v1135_v58 = vrot.slane %v887_v0, %v1048_v60  ;;  %v1058_v60 = vsel %vm1057_vm13, %v1056_v40, %v1051_v1  ;;  %1666 = vmatpush3.msra.mxu1 %v2123_v17 }
 0x1d3   : > { %v1065_v53 = vsel %vm1064_vm14, %v1063_v3, %v1058_v60  ;;  %1667 = vmatprep.subr.mxu1 %v1946_v50 }
 0x1d4   : > { %v1136_v56 = vsel %vm1050_vm12, %v1135_v58, %v1131_v43  ;;  %v1072_v52 = vsel %vm1071_vm15, %v1070_v48, %v1065_v53  ;;  %1668 = vmatpush3.msra.mxu1 %v2116_v16 }
 0x1d5   : > { %v893_v41 = vpop.xlane.xlu1 %892  ;;  %v1141_v21 = vsel %vm1057_vm13, %v1140_v20, %v1136_v56  ;;  %1669 = vmatprep.subr.mxu1 %v1946_v50 }
 0x1d6   : > { %v1145_v47 = vrot.slane %v893_v41, %v1062_v42  ;;  %1670 = vmatpush3.msra.mxu1 %v2113_v15 }
 0x1d7   : > { %1671 = vmatprep.subr.mxu1 %v1946_v50 }
 0x1d8   : > { %v1146_v61 = vsel %vm1064_vm14, %v1145_v47, %v1141_v21  ;;  %1672 = vmatpush3.msra.mxu1 %v2106_v14 }
 0x1d9   : > { %v896_v22 = vpop.xlane.xlu1 %895  ;;  %1673 = vmatprep.subr.mxu1 %v1946_v50 }
 0x1da   : > { %v1150_v27 = vrot.slane %v896_v22, %v1069_v63  ;;  %1674 = vmatpush3.msra.mxu1 %v2103_v13 }
 0x1db   : > { %1675 = vmatprep.subr.mxu1 %v1946_v50 }
 0x1dc   : > { %v1151_v25 = vsel %vm1071_vm15, %v1150_v27, %v1146_v61  ;;  %1676 = vmatpush3.msra.mxu1 %v2096_v12 }
 0x1dd   : > { %v1153_v54 = vsel %vm1152_vm0, %v1151_v25, %v1072_v52  ;;  %1677 = vmatprep.subr.mxu1 %v1946_v50 }
 0x1de   : > { %v1155_v55 = vsel %vm931_vm1, %v1153_v54, -1e+30  ;;  %1678 = vmatpush3.msra.mxu1 %v2093_v11 }
 0x1df   : > { %v1157_v46 = vsel %vm1156_vm2, %v1155_v55, -inf  ;;  %1679 = vmatprep.subr.mxu1 %v1946_v50 }
 0x1e0   : > { %1158 = vmax.xlane.f32.xlu0 %v1157_v46  ;;  %1680 = vmatpush3.msra.mxu1 %v2086_v10 }
 0x1e1   : > { %1681 = vmatprep.subr.mxu1 %v1946_v50 }
 0x1e2   : > { %1682 = vmatpush3.msra.mxu1 %v2083_v9 }
 0x1e3   : > { %1683 = vmatprep.subr.mxu1 %v1946_v50 }
 0x1e4   : > { %1684 = vmatpush3.msra.mxu1 %v2076_v8 }
 0x1e5   : > { %1685 = vmatprep.subr.mxu1 %v1946_v50 }
 0x1e6   : > { %1686 = vmatpush3.msra.mxu1 %v2073_v7 }
 0x1e7   : > { %1687 = vmatprep.subr.mxu1 %v1946_v50 }
 0x1e8   : > { %1688 = vmatpush3.msra.mxu1 %v2064_v6  ;;  %v1948_v6 = vmov 1966171168  }
 0x1e9   : > { %1689 = vmatprep.subr.mxu1 %v1946_v50  ;;  %v1170_v12 = vunpack.c.l.s4 %v1948_v6 }
 0x1ea   : > { %1690 = vmatpush3.msra.mxu1 %v2061_v5 }
 0x1eb   : > { %1691 = vmatprep.subr.mxu1 %v1946_v50 }
 0x1ec   : > { %1692 = vmatpush3.msra.mxu1 %v2058_v4  ;;  %v1171_v4 = vunpack.c.0.s8 %v1170_v12 }
 0x1ed   : > { %1696 = vmatprep.subr.mxu1 %v1946_v50 }
 0x1ee   : > { %v1174_v13 = vsub.s32 %v1171_v4, %v2370_v39  ;;  %v1853_v39 = vld [vmem:[%s2055_s26 + $0x80] sm:$0xff] }
 0x269   : > { %v1159_v8 = vpop.xlane.xlu0 %1158 }
 0x26a   : > { %v1160_v9 = vsub.f32 %v1155_v55, %v1159_v8 }
 0x26c   : > { %v1161_v10 = vmul.f32 1.442695, %v1160_v9 }
 0x26e   : > { %1844 = vpow2.f32 %v1161_v10 }
 0x27b   : > { %v1845_v7 = vpop.eup %1844 }
 0x27c   : > { %v1163_v11 = vsel %vm1156_vm2, %v1845_v7, 0.0 }
 0x27d   : > { %1164 = vadd.xlane.f32.xlu1 %v1163_v11 }
 0x306   : > { %v1165_v5 = vpop.xlane.xlu1 %1164 }
 0x307   : > { %1846 = vrcp.f32 %v1165_v5 }
 0x314   : > { %v1847_v14 = vpop.eup %1846 }
 0x315   : > { %v1167_v15 = vmul.f32 %v1847_v14, %v1845_v7 }
 0x317   : > { %v1175_v16 = vrot.slane %v1167_v15, %v1174_v13 }
 0x319   : > { %v1183_v17 = vrot.slane %v1175_v16, %v1174_v13  ;;  %v1176_v18 = vcombine.high %v1175_v16, %v1175_v16  ;;  %1522 = vst.sshfl [vmem:[%s2482_s16] sm:$0x1 pattern:$0x73625140] %v1175_v16 }
 0x31b   : > { %1694 = vmatmul.mubr.f32.vlgmr.msra.gmra.mxu1 %v1183_v17  ;;  %1523 = vst.sshfl [vmem:[%s2482_s16 + $0x1] sm:$0x1 pattern:$0x73625140] %v1176_v18  ;;  %v1190_v24 = vrot.slane %v1176_v18, %v1174_v13 }
 0x31c   : > { %1697 = vmatpush3.msra.mxu1 %v2195_v35  ;;  %1728 = vmatprep.mubr.msk.f32.mxu1 %vm1947_vm3, %v1946_v50  ;;  %v1852_v35 = vld [vmem:[%s2055_s26 + $0x88] sm:$0xff] }
 0x31d   : > { %1698 = vmatprep.subr.mxu1 %v1946_v50 }
 0x31e   : > { %1699 = vmatpush3.msra.mxu1 %v2188_v34  ;;  %v1851_v34 = vld [vmem:[%s2055_s26 + $0x90] sm:$0xff] }
 0x31f   : > { %1700 = vmatprep.subr.mxu1 %v1946_v50 }
 0x320   : > { %1701 = vmatpush3.msra.mxu1 %v2185_v33  ;;  %v1850_v33 = vld [vmem:[%s2055_s26 + $0x98] sm:$0xff] }
 0x321   : > { %1702 = vmatprep.subr.mxu1 %v1946_v50 }
 0x322   : > { %1703 = vmatpush3.msra.mxu1 %v2178_v32  ;;  %v2624_v32 = vld [vmem:[#allocation9_spill] sm:$0xff] }
 0x323   : > { %1704 = vmatprep.subr.mxu1 %v1946_v50 }
 0x324   : > { %1705 = vmatpush3.msra.mxu1 %v2175_v31  ;;  %v2625_v31 = vld [vmem:[#allocation8_spill] sm:$0xff] }
 0x325   : > { %1706 = vmatprep.subr.mxu1 %v1946_v50 }
 0x326   : > { %1707 = vmatpush3.msra.mxu1 %v2168_v30  ;;  %v1848_v30 = vld [vmem:[%s2055_s26 + $0xa8] sm:$0xff] }
 0x327   : > { %1708 = vmatprep.subr.mxu1 %v1946_v50 }
 0x328   : > { %1709 = vmatpush3.msra.mxu1 %v2165_v29  ;;  %v1849_v29 = vld [vmem:[%s2055_s26 + $0xa0] sm:$0xff]  ;;  %s1949_s26 = smov [#allocation2]  }
 0x329   : > { %1710 = vmatprep.subr.mxu1 %v1946_v50  ;;  %s1858_s10 = sshll.u32 %s1949_s26, 4  ;;  %s1859_s10 = int_to_ptr.vmem [resolvable:$false] %s1858_s10 }
 0x32a   : > { %1711 = vmatpush3.msra.mxu1 %v2623_v19  ;;  %s1860_s11 = scalar_lea.vmem %s1859_s10, 64  ;;  %p1861_p0 = scmp.lt.s32.totalorder %s2520_s17, %s1859_s10 }
 0x32b   : > { %1712 = vmatprep.subr.mxu1 %v1946_v50  ;;  %p1862_p1 = scmp.lt.s32.totalorder %s1860_s11, %s1854_s9 }
 0x32c   : > { %1713 = vmatpush3.msra.mxu1 %v2624_v32 }
 0x32d   : > { %1714 = vmatprep.subr.mxu1 %v1946_v50  ;;  %p1863_p2 = por %p1862_p1, %p1861_p0 }
 0x32e   : > { %1715 = vmatpush3.msra.mxu1 %v2625_v31 }
 0x32f   : > { %1716 = vmatprep.subr.mxu1 %v1946_v50  ;;  %p1864_p3 = pnand %p1863_p2, %p1857_p13 }
 0x330   : > { %1717 = vmatpush3.msra.mxu1 %v1848_v30 }
 0x331   : > { %1718 = vmatprep.subr.mxu1 %v1946_v50 }
 0x332   : > { %1719 = vmatpush3.msra.mxu1 %v1849_v29 }
 0x333   : > { %1720 = vmatprep.subr.mxu1 %v1946_v50 }
 0x334   : > { %1721 = vmatpush3.msra.mxu1 %v1850_v33 }
 0x335   : > { %1722 = vmatprep.subr.mxu1 %v1946_v50 }
 0x336   : > { %1723 = vmatpush3.msra.mxu1 %v1851_v34 }
 0x337   : > { %1724 = vmatprep.subr.mxu1 %v1946_v50 }
 0x338   : > { %1725 = vmatpush3.msra.mxu1 %v1852_v35 }
 0x339   : > { %1726 = vmatprep.subr.mxu1 %v1946_v50 }
 0x33a   : > { %1727 = vmatpush3.msra.mxu1 %v1853_v39 }
 0x33b   : > { %1729 = vmatmul.mubr.f32.vlgmr.msra.gmra.mxu1 %v1190_v24 }
 0x33c   : > { %1867 = shalt.err (!%p1864_p3)
}
 0x33d   : > { %s1868_s12 = scalar_lea.hbm %s2528_s28, 32  ;;  %s1872_s19 = scalar_lea.hbm %s2613_s5, 128 }
 0x33e   : > { %p1869_p4 = scmp.ne.s32.totalorder %s2528_s28, %s1868_s12  ;;  %p1873_p9 = scmp.lt.s32.totalorder %s2528_s28, %s2613_s5 }
 0x33f   : > { %p1874_p10 = scmp.lt.s32.totalorder %s1872_s19, %s1868_s12 }
 0x340   : > { %p1870_p7 = pnand %p1869_p4, %p2026_p5 }
 0x341   : > { %p1875_p11 = por %p1874_p10, %p1873_p9 }
 0x342   : > { %p1871_p8 = pneg %p1870_p7 }
 0x344   : > { %p1876_p12 = pnand %p1875_p11, %p1871_p8 }
 0x346   : > { %1879 = shalt.err (!%p1876_p12)
}
 0x347   : > { %s1950_s9 = smov 16   ;;  %s1951_s10 = smov 1   ;;  %vm1335_vm4 = vcmask 253952  }
 0x348   : > { %1731 = dma.vmem_to_hbm [thread:$0]  (%p2026_p5), %s2520_s17, 32, %s2528_s28, %s1339_s29, %s1950_s9, %s1950_s9, %s1951_s10  }
 0x349   : > { %s272_s11 = scalar_lea.vmem [#allocation4], %s1480_s15  ;;  %s2565_s19 = scalar_lea.hbm %s2614_s6, %s1533_s18 }
 0x34a   : > { %s1373_s12 = sshll.u32 %s272_s11, 4  ;;  %s1344_s17 = scalar_lea.sflag [#allocation5], %s2476_s14  ;;  %s2558_s12 = int_to_ptr.vmem [resolvable:$true] %s1373_s12 }
 0x34b   : > { %s1880_s28 = scalar_lea.vmem %s2558_s12, 32  ;;  %s1952_s15 = smov [#allocation4]  }
 0x34c   : > { %p1881_p13 = scmp.ne.s32.totalorder %s2558_s12, %s1880_s28  ;;  %s1884_s29 = sshll.u32 %s1952_s15, 4  ;;  %s1885_s29 = int_to_ptr.vmem [resolvable:$false] %s1884_s29 }
 0x34d   : > { %s1886_s25 = scalar_lea.vmem %s1885_s29, 64  ;;  %p1887_p2 = scmp.lt.s32.totalorder %s2558_s12, %s1885_s29 }
 0x34e   : > { %p1882_p0 = pnand %p1881_p13, %p2026_p5  ;;  %p1888_p3 = scmp.lt.s32.totalorder %s1886_s25, %s1880_s28 }
 0x350   : > { %p1883_p1 = pneg %p1882_p0  ;;  %p1889_p4 = por %p1888_p3, %p1887_p2 }
 0x352   : > { %p1890_p7 = pnand %p1889_p4, %p1883_p1 }
 0x3db   : > { %v1261_v49 = vpop.f32.mrf.mxu1 }
 0x3dc   : > { %1336 = vst.msk [vmem:[%s272_s11] sm:$0x1] %vm1335_vm4, %v1261_v49 }
 0x3dd   : > { %v1695_v51 = vpop.f32.mrf.mxu1 }
 0x3fb   : > { %v1331_v57 = vpop.f32.mrf.mxu1 }
 0x3fc   : > { %1337 = vst.msk [vmem:[%s272_s11 + $0x1] sm:$0x1] %vm1335_vm4, %v1331_v57 }
 0x3fd   : > { %v1730_v23 = vpop.f32.mrf.mxu1 }
 0x3fe   : > { %1893 = shalt.err (!%p1890_p7)
}
 0x3ff   : > { %s1894_s18 = scalar_lea.hbm %s2565_s19, 32  ;;  %s1898_s26 = scalar_lea.hbm %s2614_s6, 128 }
 0x400   : > { %p1895_p8 = scmp.ne.s32.totalorder %s2565_s19, %s1894_s18  ;;  %p1899_p11 = scmp.lt.s32.totalorder %s2565_s19, %s2614_s6 }
 0x401   : > { %p1900_p12 = scmp.lt.s32.totalorder %s1898_s26, %s1894_s18 }
 0x402   : > { %p1896_p9 = pnand %p1895_p8, %p2026_p5 }
 0x403   : > { %p1901_p13 = por %p1900_p12, %p1899_p11 }
 0x404   : > { %p1897_p10 = pneg %p1896_p9 }
 0x406   : > { %p1902_p0 = pnand %p1901_p13, %p1897_p10 }
 0x408   : > { %1905 = shalt.err (!%p1902_p0)
}
 0x409   : > { %1732 = dma.vmem_to_hbm [thread:$0]  (%p2026_p5), %s2558_s12, 32, %s2565_s19, %s1344_s17, %s1950_s9, %s1950_s9, %s1951_s10  }
 0x40a PF: > { %p1742_p1 = scmp.ge.s32.totalorder %s1944_s24, 2  ;;  %s1388_s16 = sand.u32 1, %s1932_s21  }
 0x40b   : > { %s1389_s28 = scalar_lea.sflag [#allocation3], %s1388_s16 }
 0x40c   : > { %p1736_p2 = pnand %p1742_p1, %p2030_p6 }
 0x40e   : > { %p1737_p3 = pneg %p1736_p2 }
 0x410   : > { %1923 = dma.done.wait (%p1737_p3), %s1389_s28, 32  }
 0x411   : > { %1925 = vsyncadd (%p1737_p3), %s1389_s28, 4294967264  ;;  %s1398_s15 = scalar_lea.sflag [#allocation5], %s1388_s16 }
 0x412   : > { %1927 = dma.done.wait (%p1737_p3), %s1398_s15, 32  }
 0x413   : > { %1929 = vsyncadd (%p1737_p3), %s1398_s15, 4294967264  ;;  %p20_p5 = scmp.ge.s32.totalorder %s2013_s27, 6   ;;  %s2626_s21 = smov %s1936_s22 }
 0x414   : > { %s2627_s22 = smov %s1940_s23  ;;  %s2628_s23 = smov %s2024_s30 }
 0x415   : > { %s2629_s24 = smov %s2013_s27  ;;  %22 = sbr.rel (!%p20_p5) target bundleno = 5 (0x5), region = 95 }
 0x41a   :  { %1403 = vsyncpa [#allocation3], 1 }
 0x41b   :  { %1405 = vsyncpa [#allocation3 + $0x1], 1 }
 0x41c   :  { %1406 = vsyncpa [#allocation5], 1 }
 0x41d   :  { %1408 = vsyncpa [#allocation5 + $0x1], 1 }

// kernel: tpu_custom_call.1
= control target key start
LH: loop header
LB: loop body
LE: loop exit
PB: predicated region body
PF: predicated region fallthrough
CT: control target
= control target key end

     0   :  { %12 = vsyncpa [#allocation3], 0  ;;  %s2608_s0 = inlined_call_operand.vmem [shape: f32[8,128,32], index: 0, kind: input, shape index: {}]   ;;  %s2609_s1 = inlined_call_operand.vmem [shape: f32[8,1,32], index: 1, kind: input, shape index: {}]   ;;  %s2610_s2 = inlined_call_operand.vmem [shape: f32[32,32], index: 2, kind: input, shape index: {}]   ;;  %s2611_s3 = inlined_call_operand.vmem [shape: f32[1,32], index: 3, kind: input, shape index: {}]   ;;  %s2612_s4 = inlined_call_operand.vmem [shape: f32[1,32], index: 4, kind: input, shape index: {}]   ;;  %s2613_s5 = inlined_call_operand.hbm [shape: f32[8,1,128], index: 5, kind: output, shape index: {0}]   ;;  %s2614_s6 = inlined_call_operand.hbm [shape: f32[8,1,32], index: 6, kind: output, shape index: {1}]  }
   0x1   :  { %14 = vsyncpa [#allocation3 + $0x1], 0 }
   0x2   :  { %15 = vsyncpa [#allocation5], 0 }
   0x3   :  { %17 = vsyncpa [#allocation5 + $0x1], 0  ;;  %s1988_s21 = smov 0   ;;  %s1990_s22 = smov 0  }
   0x4   :  { %s1992_s23 = smov 0   ;;  %s1994_s24 = smov 0  }
   0x5 LB: > { %s2009_s25 = sadd.s32 4294967295, %s1944_s24   ;;  %s1476_s26 = sadd.s32 4294967294, %s1944_s24   ;;  %s1944_s24 = sphi %s1994_s24, %s2629_s24   ;;  %s1940_s23 = sphi %s1992_s23, %s2628_s23   ;;  %s1936_s22 = sphi %s1990_s22, %s2627_s22   ;;  %s1932_s21 = sphi %s1988_s21, %s2626_s21  }
   0x6   : > { %s2013_s27 = sadd.s32 1, %s1944_s24   ;;  %s145_s28 = sadd.s32 1, %s1940_s23 }
   0x7   : > { %s142_s29 = ssub.s32 %s1944_s24, %s2013_s27  ;;  %p155_p0 = scmp.ne.s32.totalorder %s1940_s23, %s1936_s22 }
   0x8   : > { %p143_p1 = scmp.eq.s32.totalorder %s142_s29, 0  ;;  %p156_p2 = scmp.eq.s32.totalorder %s2009_s25, 3 }
   0x9   : > { %p161_p3 = scmp.ne.s32.totalorder %s1936_s22, %s1932_s21  ;;  %p162_p4 = scmp.eq.s32.totalorder %s1476_s26, 3 }
   0xa   : > { %s2024_s30 = scalar_select %p143_p1, %s1940_s23, %s145_s28  }
   0xb   : > { %p2026_p5 = por %p156_p2, %p155_p0  ;;  %p2030_p6 = por %p162_p4, %p161_p3 }
   0xc   : > { %p1479_p7 = scmp.ge.s32.totalorder %s1944_s24, 1  ;;  %p233_p8 = scmp.lt.s32.totalorder %s1944_s24, 5 }
   0xe   : > { %p234_p9 = pnand %p1479_p7, %p233_p8 }
  0x10   : > { %237 = sbr.rel (%p234_p9) target bundleno = 1034 (0x40a), region = 40 }
  0x15   : > { %v324_v0 = vld [vmem:[%s2610_s2 + $0x18] sm:$0xff]  ;;  %v323_v1 = vld [vmem:[%s2610_s2 + $0x10] sm:$0xff]  ;;  %s1482_s13 = sshll.u32 %s2009_s25, 1  ;;  %v322_v2 = vld [vmem:[%s2610_s2 + $0x8] sm:$0xff]  ;;  %vm325_vm0 = vcmask 261120   ;;  %vm973_vm1 = vcmask 130112  }
  0x16   : > { %1605 = vmatprep.subr.mxu0 %v324_v0  ;;  %p274_p10 = scmp.lt.s32.totalorder %s1482_s13, 7  ;;  %v321_v3 = vld [vmem:[%s2610_s2] sm:$0xff]  ;;  %vm980_vm2 = vcmask 195712   ;;  %vm987_vm3 = vcmask 261312   ;;  %vm994_vm4 = vcmask 326912   ;;  %vm1001_vm5 = vcmask 392512  }
  0x17   : > { %1606 = vmatpush3.msra.mxu0 %v324_v0  ;;  %v2208_v36 = vld [vmem:[%s2611_s3] ss:$0 sm:$0xff]  ;;  %vm1008_vm6 = vcmask 458112   ;;  %vm1015_vm7 = vcmask 523712   ;;  %vm1022_vm8 = vcmask 589312   ;;  %vm1029_vm9 = vcmask 654912  }
  0x18   : > { %1607 = vmatprep.subr.mxu0 %v323_v1  ;;  %s2631_s13 = smov (!%p274_p10, %s1482_s13), 7  ;;  %v2228_v59 = vld [vmem:[%s2612_s4] ss:$0 sm:$0xff]  ;;  %vm1036_vm10 = vcmask 720512   ;;  %vm1043_vm11 = vcmask 786112   ;;  %vm1050_vm12 = vcmask 851712  }
  0x19   : > { %1608 = vmatpush3.msra.mxu0 %v323_v1  ;;  %s1532_s18 = sshll.u32 %s2631_s13, 7  ;;  %s2203_s9 = scalar_lea.vmem %s2609_s1, %s2631_s13  ;;  %vm1057_vm13 = vcmask 917312   ;;  %vm1064_vm14 = vcmask 982912   ;;  %vm1071_vm15 = vcmask 1048512  }
  0x1a   : > { %1609 = vmatprep.subr.mxu0 %v322_v2  ;;  %s2055_s26 = scalar_lea.vmem %s2608_s0, %s1532_s18  ;;  %v2211_v37 = vld [vmem:[%s2203_s9] ss:$0 sm:$0xff]  ;;  %s2476_s14 = sand.u32 1, %s1936_s22  }
  0x1b   : > { %1610 = vmatpush3.msra.mxu0 %v322_v2  ;;  %v2058_v4 = vld [vmem:[%s2055_s26] sm:$0xff]  ;;  %v2061_v5 = vld [vmem:[%s2055_s26 + $0x8] sm:$0xff]  ;;  %v2064_v6 = vld [vmem:[%s2055_s26 + $0x10] sm:$0xff]  ;;  %s1480_s15 = sshll.u32 %s2476_s14, 1  ;;  %s1533_s18 = sshll.u32 %s2009_s25, 5 }
  0x1c   : > { %1611 = vmatprep.subr.mxu0 %v321_v3  ;;  %1613 = vmatprep.mubr.msk.f32.mxu0 %vm325_vm0, %v2058_v4  ;;  %v2073_v7 = vld [vmem:[%s2055_s26 + $0x18] sm:$0xff]  ;;  %v2076_v8 = vld [vmem:[%s2055_s26 + $0x20] sm:$0xff]  ;;  %v2083_v9 = vld [vmem:[%s2055_s26 + $0x28] sm:$0xff]  ;;  %s2482_s16 = scalar_lea.vmem [#allocation2], %s1480_s15  ;;  %s2528_s28 = scalar_lea.hbm %s2613_s5, %s1533_s18 }
  0x1d   : > { %1612 = vmatpush3.msra.mxu0 %v321_v3  ;;  %v2086_v10 = vld [vmem:[%s2055_s26 + $0x30] sm:$0xff]  ;;  %v2093_v11 = vld [vmem:[%s2055_s26 + $0x38] sm:$0xff]  ;;  %v2096_v12 = vld [vmem:[%s2055_s26 + $0x40] sm:$0xff]  ;;  %s1357_s17 = sshll.u32 %s2482_s16, 4  ;;  %s1339_s29 = scalar_lea.sflag [#allocation3], %s2476_s14  ;;  %s2520_s17 = int_to_ptr.vmem [resolvable:$true] %s1357_s17 }
  0x1e   : > { %1614 = vmatmul.mubr.msk.f32.vlgmr.msra.gmra.mxu0 %vm325_vm0, %v2061_v5  ;;  %v2103_v13 = vld [vmem:[%s2055_s26 + $0x48] sm:$0xff]  ;;  %v2106_v14 = vld [vmem:[%s2055_s26 + $0x50] sm:$0xff]  ;;  %v2113_v15 = vld [vmem:[%s2055_s26 + $0x58] sm:$0xff] }
  0x1f   : > { %1616 = vmatprep.mubr.msk.f32.mxu0 %vm325_vm0, %v2064_v6  ;;  %v2116_v16 = vld [vmem:[%s2055_s26 + $0x60] sm:$0xff]  ;;  %v2123_v17 = vld [vmem:[%s2055_s26 + $0x68] sm:$0xff]  ;;  %v2126_v18 = vld [vmem:[%s2055_s26 + $0x70] sm:$0xff] }
  0x20   : > { %v2133_v19 = vld [vmem:[%s2055_s26 + $0x78] sm:$0xff]  ;;  %v303_v20 = vld [vmem:[%s2055_s26 + $0x80] sm:$0xff]  ;;  %v304_v21 = vld [vmem:[%s2055_s26 + $0x88] sm:$0xff] }
  0x21   : > { %v305_v22 = vld [vmem:[%s2055_s26 + $0x90] sm:$0xff]  ;;  %v306_v23 = vld [vmem:[%s2055_s26 + $0x98] sm:$0xff]  ;;  %v307_v24 = vld [vmem:[%s2055_s26 + $0xa0] sm:$0xff] }
  0x22   : > { %1617 = vmatmul.mubr.msk.f32.gmra.mxu0 %vm325_vm0, %v2073_v7  ;;  %v308_v25 = vld [vmem:[%s2055_s26 + $0xa8] sm:$0xff]  ;;  %v2149_v26 = vld [vmem:[%s2055_s26 + $0xb0] sm:$0xff]  ;;  %v2155_v27 = vld [vmem:[%s2055_s26 + $0xb8] sm:$0xff] }
  0x23   : > { %1619 = vmatprep.mubr.msk.f32.mxu0 %vm325_vm0, %v2076_v8  ;;  %2620 = vst [vmem:[#allocation8_spill] sm:$0xff] %v2149_v26  ;;  %2621 = vst [vmem:[#allocation9_spill] sm:$0xff] %v2155_v27  ;;  %v2158_v28 = vld [vmem:[%s2055_s26 + $0xc0] sm:$0xff]  ;;  %v2165_v29 = vld [vmem:[%s2055_s26 + $0xc8] sm:$0xff] }
  0x24   : > { %2622 = vst [vmem:[#allocation10_spill] sm:$0xff] %v2158_v28  ;;  %v2168_v30 = vld [vmem:[%s2055_s26 + $0xd0] sm:$0xff]  ;;  %v2175_v31 = vld [vmem:[%s2055_s26 + $0xd8] sm:$0xff]  ;;  %v2178_v32 = vld [vmem:[%s2055_s26 + $0xe0] sm:$0xff] }
  0x25   : > { %v2185_v33 = vld [vmem:[%s2055_s26 + $0xe8] sm:$0xff]  ;;  %v2188_v34 = vld [vmem:[%s2055_s26 + $0xf0] sm:$0xff]  ;;  %v2195_v35 = vld [vmem:[%s2055_s26 + $0xf8] sm:$0xff] }
  0x26   : > { %1620 = vmatmul.mubr.msk.f32.gmra.mxu0 %vm325_vm0, %v2083_v9 }
  0x27   : > { %1622 = vmatprep.mubr.msk.f32.mxu0 %vm325_vm0, %v2086_v10 }
  0x2a   : > { %1623 = vmatmul.mubr.msk.f32.gmra.mxu0 %vm325_vm0, %v2093_v11 }
  0x2b   : > { %1625 = vmatprep.mubr.msk.f32.mxu0 %vm325_vm0, %v2096_v12 }
  0x2e   : > { %1626 = vmatmul.mubr.msk.f32.gmra.mxu0 %vm325_vm0, %v2103_v13 }
  0x2f   : > { %1628 = vmatprep.mubr.msk.f32.mxu0 %vm325_vm0, %v2106_v14 }
  0x32   : > { %1629 = vmatmul.mubr.msk.f32.gmra.mxu0 %vm325_vm0, %v2113_v15 }
  0x33   : > { %1631 = vmatprep.mubr.msk.f32.mxu0 %vm325_vm0, %v2116_v16 }
  0x36   : > { %1632 = vmatmul.mubr.msk.f32.gmra.mxu0 %vm325_vm0, %v2123_v17 }
  0x37   : > { %1634 = vmatprep.mubr.msk.f32.mxu0 %vm325_vm0, %v2126_v18 }
  0x3a   : > { %1635 = vmatmul.mubr.msk.f32.gmra.mxu0 %vm325_vm0, %v2133_v19 }
  0x3b   : > { %1637 = vmatprep.mubr.msk.f32.mxu0 %vm325_vm0, %v303_v20 }
  0x3e   : > { %1638 = vmatmul.mubr.msk.f32.gmra.mxu0 %vm325_vm0, %v304_v21 }
  0x3f   : > { %1640 = vmatprep.mubr.msk.f32.mxu0 %vm325_vm0, %v305_v22 }
  0x42   : > { %1641 = vmatmul.mubr.msk.f32.gmra.mxu0 %vm325_vm0, %v306_v23 }
  0x43   : > { %1643 = vmatprep.mubr.msk.f32.mxu0 %vm325_vm0, %v307_v24 }
  0x46   : > { %1644 = vmatmul.mubr.msk.f32.gmra.mxu0 %vm325_vm0, %v308_v25 }
  0x47   : > { %1646 = vmatprep.mubr.msk.f32.mxu0 %vm325_vm0, %v2149_v26 }
  0x4a   : > { %1647 = vmatmul.mubr.msk.f32.gmra.mxu0 %vm325_vm0, %v2155_v27 }
  0x4b   : > { %1649 = vmatprep.mubr.msk.f32.mxu0 %vm325_vm0, %v2158_v28 }
  0x4e   : > { %1650 = vmatmul.mubr.msk.f32.gmra.mxu0 %vm325_vm0, %v2165_v29 }
  0x4f   : > { %1652 = vmatprep.mubr.msk.f32.mxu0 %vm325_vm0, %v2168_v30 }
  0x52   : > { %1653 = vmatmul.mubr.msk.f32.gmra.mxu0 %vm325_vm0, %v2175_v31 }
  0x53   : > { %1655 = vmatprep.mubr.msk.f32.mxu0 %vm325_vm0, %v2178_v32 }
  0x56   : > { %1656 = vmatmul.mubr.msk.f32.gmra.mxu0 %vm325_vm0, %v2185_v33 }
  0x57   : > { %1658 = vmatprep.mubr.msk.f32.mxu0 %vm325_vm0, %v2188_v34 }
  0x5a   : > { %1659 = vmatmul.mubr.msk.f32.gmra.mxu0 %vm325_vm0, %v2195_v35 }
  0xde   : > { %v1615_v38 = vpop.f32.mrf.mxu0 }
  0xdf   : > { %v655_v39 = vadd.f32 %v1615_v38, %v2208_v36 }
  0xe0   : > { %v488_v40 = vpop.f32.mrf.mxu0 }
  0xe1   : > { %v699_v41 = vadd.f32 %v2211_v37, %v655_v39  ;;  %v654_v42 = vadd.f32 %v2208_v36, %v488_v40 }
  0xe2   : > { %v1618_v43 = vpop.f32.mrf.mxu0 }
  0xe3   : > { %1780 = vtanh.f32 %v699_v41  ;;  %v698_v44 = vadd.f32 %v2211_v37, %v654_v42  ;;  %v657_v45 = vadd.f32 %v1618_v43, %v2208_v36 }
  0xe4   : > { %v498_v46 = vpop.f32.mrf.mxu0 }
  0xe5   : > { %1782 = vtanh.f32 %v698_v44  ;;  %v701_v47 = vadd.f32 %v2211_v37, %v657_v45  ;;  %v656_v48 = vadd.f32 %v2208_v36, %v498_v46 }
  0xe6   : > { %v1621_v49 = vpop.f32.mrf.mxu0 }
  0xe7   : > { %1784 = vtanh.f32 %v701_v47  ;;  %v700_v50 = vadd.f32 %v2211_v37, %v656_v48  ;;  %v659_v51 = vadd.f32 %v1621_v49, %v2208_v36 }
  0xe8   : > { %v508_v52 = vpop.f32.mrf.mxu0 }
  0xe9   : > { %v703_v53 = vadd.f32 %v2211_v37, %v659_v51  ;;  %1786 = vtanh.f32 %v700_v50  ;;  %v658_v55 = vadd.f32 %v2208_v36, %v508_v52  ;;  %v2247_v52 = vld [vmem:[%s2203_s9 + $0x1] ss:$0 sm:$0xff]  ;;  %s1854_s9 = scalar_lea.vmem %s2520_s17, 32 }
  0xea   : > { %v1624_v54 = vpop.f32.mrf.mxu0  ;;  %p1855_p11 = scmp.ne.s32.totalorder %s2520_s17, %s1854_s9 }
  0xeb   : > { %1788 = vtanh.f32 %v703_v53  ;;  %v661_v57 = vadd.f32 %v1624_v54, %v2208_v36  ;;  %v702_v60 = vadd.f32 %v2211_v37, %v658_v55 }
  0xec   : > { %v518_v56 = vpop.f32.mrf.mxu0  ;;  %p1856_p12 = pnand %p1855_p11, %p2026_p5 }
  0xed   : > { %v705_v1 = vadd.f32 %v2211_v37, %v661_v57  ;;  %1790 = vtanh.f32 %v702_v60  ;;  %v660_v3 = vadd.f32 %v2208_v36, %v518_v56 }
  0xee   : > { %v1627_v58 = vpop.f32.mrf.mxu0  ;;  %p1857_p13 = pneg %p1856_p12 }
  0xef   : > { %1792 = vtanh.f32 %v705_v1  ;;  %v663_v24 = vadd.f32 %v1627_v58, %v2208_v36  ;;  %v704_v38 = vadd.f32 %v2211_v37, %v660_v3 }
  0xf0   : > { %v1781_v61 = vpop.eup %1780  ;;  %v528_v62 = vpop.f32.mrf.mxu0 }
  0xf1   : > { %v770_v63 = vmul.f32 %v1781_v61, %v2228_v59  ;;  %v707_v43 = vadd.f32 %v2211_v37, %v663_v24  ;;  %v662_v44 = vadd.f32 %v2208_v36, %v528_v62  ;;  %1794 = vtanh.f32 %v704_v38 }
  0xf2   : > { %v1783_v0 = vpop.eup %1782  ;;  %v1630_v2 = vpop.f32.mrf.mxu0 }
  0xf3   : > { %v804_v20 = vsel %vm325_vm0, %v770_v63, 0.0  ;;  %v769_v23 = vmul.f32 %v1783_v0, %v2228_v59  ;;  %v665_v49 = vadd.f32 %v1630_v2, %v2208_v36  ;;  %1796 = vtanh.f32 %v707_v43 }
  0xf4   : > { %v1785_v21 = vpop.eup %1784  ;;  %805 = vadd.xlane.f32.xlu0 %v804_v20  ;;  %v538_v22 = vpop.f32.mrf.mxu0  ;;  %v706_v51 = vadd.f32 %v2211_v37, %v662_v44 }
  0xf5   : > { %v801_v39 = vsel %vm325_vm0, %v769_v23, 0.0  ;;  %v772_v40 = vmul.f32 %v1785_v21, %v2228_v59  ;;  %v709_v58 = vadd.f32 %v2211_v37, %v665_v49  ;;  %v664_v63 = vadd.f32 %v2208_v36, %v538_v22 }
  0xf6   : > { %v1633_v25 = vpop.f32.mrf.mxu0  ;;  %v1787_v41 = vpop.eup %1786  ;;  %1798 = vtanh.f32 %v706_v51 }
  0xf7   : > { %v810_v47 = vsel %vm325_vm0, %v772_v40, 0.0  ;;  %v771_v48 = vmul.f32 %v1787_v41, %v2228_v59  ;;  %v708_v22 = vadd.f32 %v2211_v37, %v664_v63 }
  0xf8   : > { %802 = vadd.xlane.f32.xlu0 %v801_v39  ;;  %v548_v42 = vpop.f32.mrf.mxu0  ;;  %v1789_v46 = vpop.eup %1788  ;;  %v667_v39 = vadd.f32 %v1633_v25, %v2208_v36 }
  0xf9   : > { %v774_v54 = vmul.f32 %v1789_v46, %v2228_v59  ;;  %v807_v56 = vsel %vm325_vm0, %v771_v48, 0.0  ;;  %v666_v40 = vadd.f32 %v2208_v36, %v548_v42 }
  0xfa   : > { %v1636_v45 = vpop.f32.mrf.mxu0  ;;  %v1791_v57 = vpop.eup %1790  ;;  %v711_v25 = vadd.f32 %v2211_v37, %v667_v39 }
  0xfb   : > { %v816_v0 = vsel %vm325_vm0, %v774_v54, 0.0  ;;  %v773_v21 = vmul.f32 %v1791_v57, %v2228_v59  ;;  %v669_v49 = vadd.f32 %v1636_v45, %v2208_v36 }
  0xfc   : > { %811 = vadd.xlane.f32.xlu0 %v810_v47  ;;  %v558_v50 = vpop.f32.mrf.mxu0  ;;  %v1793_v2 = vpop.eup %1792 }
  0xfd   : > { %v776_v41 = vmul.f32 %v1793_v2, %v2228_v59  ;;  %v813_v46 = vsel %vm325_vm0, %v773_v21, 0.0  ;;  %v713_v45 = vadd.f32 %v2211_v37, %v669_v49 }
  0xfe   : > { %v1639_v53 = vpop.f32.mrf.mxu0  ;;  %v1795_v48 = vpop.eup %1794 }
  0xff   : > { %v671_v55 = vadd.f32 %v1639_v53, %v2208_v36  ;;  %v822_v57 = vsel %vm325_vm0, %v776_v41, 0.0 }
 0x100   : > { %808 = vadd.xlane.f32.xlu0 %v807_v56  ;;  %v568_v60 = vpop.f32.mrf.mxu0  ;;  %v710_v56 = vadd.f32 %v2211_v37, %v666_v40 }
 0x101   : > { %v715_v61 = vadd.f32 %v2247_v52, %v671_v55  ;;  %v670_v62 = vadd.f32 %v2208_v36, %v568_v60  ;;  %v1797_v55 = vpop.eup %1796 }
 0x102   : > { %v1642_v1 = vpop.f32.mrf.mxu0 }
 0x103   : > { %1800 = vtanh.f32 %v715_v61  ;;  %v714_v3 = vadd.f32 %v2247_v52, %v670_v62  ;;  %v673_v20 = vadd.f32 %v1642_v1, %v2208_v36  ;;  %v668_v62 = vadd.f32 %v2208_v36, %v558_v50  ;;  %v1799_v2 = vpop.eup %1798 }
 0x104   : > { %1802 = vtanh.f32 %v709_v58  ;;  %817 = vadd.xlane.f32.xlu0 %v816_v0  ;;  %v578_v23 = vpop.f32.mrf.mxu0  ;;  %v775_v58 = vmul.f32 %v1795_v48, %v2228_v59  ;;  %v778_v0 = vmul.f32 %v1797_v55, %v2228_v59 }
 0x105   : > { %1804 = vtanh.f32 %v714_v3  ;;  %v717_v24 = vadd.f32 %v2247_v52, %v673_v20  ;;  %v672_v38 = vadd.f32 %v2208_v36, %v578_v23 }
 0x106   : > { %v1645_v43 = vpop.f32.mrf.mxu0  ;;  %v819_v3 = vsel %vm325_vm0, %v775_v58, 0.0 }
 0x107   : > { %1806 = vtanh.f32 %v717_v24  ;;  %v716_v44 = vadd.f32 %v2247_v52, %v672_v38  ;;  %v675_v47 = vadd.f32 %v1645_v43, %v2208_v36  ;;  %v712_v38 = vadd.f32 %v2211_v37, %v668_v62 }
 0x108   : > { %814 = vadd.xlane.f32.xlu0 %v813_v46  ;;  %v588_v51 = vpop.f32.mrf.mxu0  ;;  %1808 = vtanh.f32 %v708_v22  ;;  %v828_v43 = vsel %vm325_vm0, %v778_v0, 0.0  ;;  %v777_v46 = vmul.f32 %v1799_v2, %v2228_v59 }
 0x109   : > { %v719_v53 = vadd.f32 %v2247_v52, %v675_v47  ;;  %v674_v42 = vadd.f32 %v2208_v36, %v588_v51  ;;  %1810 = vtanh.f32 %v716_v44 }
 0x10a   : > { %v1648_v54 = vpop.f32.mrf.mxu0 }
 0x10b   : > { %v677_v60 = vadd.f32 %v1648_v54, %v2208_v36  ;;  %1812 = vtanh.f32 %v719_v53  ;;  %v718_v63 = vadd.f32 %v2247_v52, %v674_v42 }
 0x10c   : > { %823 = vadd.xlane.f32.xlu0 %v822_v57  ;;  %v598_v61 = vpop.f32.mrf.mxu0  ;;  %1814 = vtanh.f32 %v711_v25 }
 0x10d   : > { %1816 = vtanh.f32 %v710_v56  ;;  %v721_v23 = vadd.f32 %v2247_v52, %v677_v60  ;;  %v676_v44 = vadd.f32 %v2208_v36, %v598_v61  ;;  %v825_v60 = vsel %vm325_vm0, %v777_v46, 0.0 }
 0x10e   : > { %v1651_v1 = vpop.f32.mrf.mxu0  ;;  %1818 = vtanh.f32 %v713_v45 }
 0x10f   : > { %v679_v20 = vadd.f32 %v1651_v1, %v2208_v36  ;;  %1820 = vtanh.f32 %v718_v63  ;;  %v720_v55 = vadd.f32 %v2247_v52, %v676_v44 }
 0x110   : > { %v1801_v21 = vpop.eup %1800  ;;  %820 = vadd.xlane.f32.xlu0 %v819_v3  ;;  %v608_v24 = vpop.f32.mrf.mxu0 }
 0x111   : > { %v1803_v50 = vpop.eup %1802  ;;  %v786_v22 = vmul.f32 %v1801_v21, %v2228_v59  ;;  %v723_v39 = vadd.f32 %v2247_v52, %v679_v20  ;;  %v678_v40 = vadd.f32 %v2208_v36, %v608_v24 }
 0x112   : > { %v1805_v41 = vpop.eup %1804  ;;  %v1654_v47 = vpop.f32.mrf.mxu0  ;;  %v780_v56 = vmul.f32 %v1803_v50, %v2228_v59 }
 0x113   : > { %v852_v48 = vsel %vm325_vm0, %v786_v22, 0.0  ;;  %v785_v49 = vmul.f32 %v1805_v41, %v2228_v59  ;;  %1822 = vtanh.f32 %v723_v39  ;;  %v722_v37 = vadd.f32 %v2247_v52, %v678_v40 }
 0x114   : > { %v1807_v51 = vpop.eup %1806  ;;  %829 = vadd.xlane.f32.xlu0 %v828_v43  ;;  %853 = vadd.xlane.f32.xlu1 %v852_v48  ;;  %1824 = vtanh.f32 %v721_v23  ;;  %v681_v53 = vadd.f32 %v1654_v47, %v2208_v36  ;;  %v618_v25 = vpop.f32.mrf.mxu0  ;;  %v834_v21 = vsel %vm325_vm0, %v780_v56, 0.0 }
 0x115   : > { %v788_v42 = vmul.f32 %v1807_v51, %v2228_v59  ;;  %1826 = vtanh.f32 %v722_v37  ;;  %v680_v54 = vadd.f32 %v2208_v36, %v618_v25  ;;  %v1809_v45 = vpop.eup %1808  ;;  %v849_v61 = vsel %vm325_vm0, %v785_v49, 0.0 }
 0x116   : > { %1828 = vtanh.f32 %v712_v38  ;;  %v725_v57 = vadd.f32 %v2247_v52, %v681_v53  ;;  %v1657_v58 = vpop.f32.mrf.mxu0  ;;  %v1811_v0 = vpop.eup %1810  ;;  %v779_v38 = vmul.f32 %v1809_v45, %v2228_v59 }
 0x117   : > { %v724_v62 = vadd.f32 %v2247_v52, %v680_v54  ;;  %v683_v63 = vadd.f32 %v1657_v58, %v2208_v36  ;;  %v858_v2 = vsel %vm325_vm0, %v788_v42, 0.0  ;;  %v787_v22 = vmul.f32 %v1811_v0, %v2228_v59 }
 0x118   : > { %826 = vadd.xlane.f32.xlu0 %v825_v60  ;;  %850 = vadd.xlane.f32.xlu1 %v849_v61  ;;  %1830 = vtanh.f32 %v725_v57  ;;  %v628_v1 = vpop.f32.mrf.mxu0  ;;  %v1813_v20 = vpop.eup %1812  ;;  %v831_v51 = vsel %vm325_vm0, %v779_v38, 0.0 }
 0x119   : > { %1832 = vtanh.f32 %v724_v62  ;;  %v727_v3 = vadd.f32 %v2247_v52, %v683_v63  ;;  %v682_v23 = vadd.f32 %v2208_v36, %v628_v1  ;;  %v1815_v50 = vpop.eup %1814  ;;  %v790_v46 = vmul.f32 %v1813_v20, %v2228_v59 }
 0x11a   : > { %1834 = vtanh.f32 %v720_v55  ;;  %v1660_v24 = vpop.f32.mrf.mxu0  ;;  %v1817_v40 = vpop.eup %1816  ;;  %v782_v49 = vmul.f32 %v1815_v50, %v2228_v59  ;;  %v855_v53 = vsel %vm325_vm0, %v787_v22, 0.0 }
 0x11b   : > { %1836 = vtanh.f32 %v727_v3  ;;  %v685_v39 = vadd.f32 %v1660_v24, %v2208_v36  ;;  %v726_v41 = vadd.f32 %v2247_v52, %v682_v23  ;;  %v1819_v44 = vpop.eup %1818  ;;  %v864_v55 = vsel %vm325_vm0, %v790_v46, 0.0 }
 0x11c   : > { %835 = vadd.xlane.f32.xlu0 %v834_v21  ;;  %859 = vadd.xlane.f32.xlu1 %v858_v2  ;;  %v638_v43 = vpop.f32.mrf.mxu0  ;;  %v1821_v37 = vpop.eup %1820  ;;  %v840_v58 = vsel %vm325_vm0, %v782_v49, 0.0  ;;  %v781_v45 = vmul.f32 %v1817_v40, %v2228_v59 }
 0x11d   : > { %v729_v47 = vadd.f32 %v2247_v52, %v685_v39  ;;  %v684_v48 = vadd.f32 %v2208_v36, %v638_v43  ;;  %1838 = vtanh.f32 %v726_v41  ;;  %v789_v60 = vmul.f32 %v1821_v37, %v2228_v59 }
 0x11e   : > { %v837_v2 = vsel %vm325_vm0, %v781_v45, 0.0  ;;  %v784_v39 = vmul.f32 %v1819_v44, %v2228_v59 }
 0x11f   : > { %1840 = vtanh.f32 %v729_v47  ;;  %v728_v25 = vadd.f32 %v2247_v52, %v684_v48  ;;  %v861_v3 = vsel %vm325_vm0, %v789_v60, 0.0 }
 0x120   : > { %v1823_v42 = vpop.eup %1822  ;;  %832 = vadd.xlane.f32.xlu0 %v831_v51  ;;  %856 = vadd.xlane.f32.xlu1 %v855_v53  ;;  %v846_v48 = vsel %vm325_vm0, %v784_v39, 0.0 }
 0x121   : > { %v1825_v54 = vpop.eup %1824  ;;  %v794_v56 = vmul.f32 %v1823_v42, %v2228_v59  ;;  %1842 = vtanh.f32 %v728_v25 }
 0x122   : > { %v1827_v36 = vpop.eup %1826  ;;  %v792_v62 = vmul.f32 %v1825_v54, %v2228_v59 }
 0x123   : > { %v1829_v57 = vpop.eup %1828  ;;  %v793_v61 = vmul.f32 %v1827_v36, %v2228_v59  ;;  %v876_v44 = vsel %vm325_vm0, %v794_v56, 0.0 }
 0x124   : > { %841 = vadd.xlane.f32.xlu0 %v840_v58  ;;  %865 = vadd.xlane.f32.xlu1 %v864_v55  ;;  %v783_v20 = vmul.f32 %v1829_v57, %v2228_v59  ;;  %v870_v24 = vsel %vm325_vm0, %v792_v62, 0.0 }
 0x125   : > { %v1831_v52 = vpop.eup %1830  ;;  %v873_v51 = vsel %vm325_vm0, %v793_v61, 0.0 }
 0x126   : > { %v1833_v63 = vpop.eup %1832  ;;  %v796_v0 = vmul.f32 %v1831_v52, %v2228_v59  ;;  %v843_v22 = vsel %vm325_vm0, %v783_v20, 0.0  ;;  %v929_v20 = vlaneseq }
 0x127   : > { %v1835_v1 = vpop.eup %1834  ;;  %v795_v21 = vmul.f32 %v1833_v63, %v2228_v59 }
 0x128   : > { %v1837_v23 = vpop.eup %1836  ;;  %838 = vadd.xlane.f32.xlu0 %v837_v2  ;;  %862 = vadd.xlane.f32.xlu1 %v861_v3  ;;  %v791_v40 = vmul.f32 %v1835_v1, %v2228_v59  ;;  %v882_v53 = vsel %vm325_vm0, %v796_v0, 0.0  ;;  %v2370_v39 = vshrl.u32 %v929_v20, 7 }
 0x129   : > { %v798_v50 = vmul.f32 %v1837_v23, %v2228_v59  ;;  %v879_v25 = vsel %vm325_vm0, %v795_v21, 0.0 }
 0x12a   : > { %v1839_v38 = vpop.eup %1838  ;;  %v867_v49 = vsel %vm325_vm0, %v791_v40, 0.0 }
 0x12b   : > { %v797_v43 = vmul.f32 %v1839_v38, %v2228_v59  ;;  %v888_v42 = vsel %vm325_vm0, %v798_v50, 0.0 }
 0x12c   : > { %v1841_v41 = vpop.eup %1840  ;;  %844 = vadd.xlane.f32.xlu0 %v843_v22  ;;  %871 = vadd.xlane.f32.xlu1 %v870_v24  ;;  %v2363_v24 = vand.u32 127, %v929_v20 }
 0x12d   : > { %v800_v46 = vmul.f32 %v1841_v41, %v2228_v59  ;;  %v885_v54 = vsel %vm325_vm0, %v797_v43, 0.0 }
 0x12e   : > { %v1843_v47 = vpop.eup %1842  ;;  %v975_v38 = vadd.s32 4294967280, %v2363_v24  ;;  %v968_v40 = vadd.s32 4294967288, %v2363_v24  ;;  %v966_v43 = vsub.s32 %v2363_v24, %v2370_v39  ;;  %v1010_v26 = vadd.s32 4294967240, %v2363_v24 }
 0x12f   : > { %v799_v37 = vmul.f32 %v1843_v47, %v2228_v59  ;;  %v894_v55 = vsel %vm325_vm0, %v800_v46, 0.0  ;;  %v982_v46 = vadd.s32 4294967272, %v2363_v24 }
 0x130   : > { %847 = vadd.xlane.f32.xlu0 %v846_v48  ;;  %868 = vadd.xlane.f32.xlu1 %v867_v49  ;;  %v978_v47 = vsub.s32 %v975_v38, %v2370_v39  ;;  %v989_v48 = vadd.s32 4294967264, %v2363_v24  ;;  %v971_v49 = vsub.s32 %v968_v40, %v2370_v39  ;;  %v996_v38 = vadd.s32 4294967256, %v2363_v24 }
 0x131   : > { %v891_v59 = vsel %vm325_vm0, %v799_v37, 0.0  ;;  %vm1152_vm0 = vcmask 1041409  }
 0x134   : > { %877 = vadd.xlane.f32.xlu1 %v876_v44 }
 0x138   : > { %874 = vadd.xlane.f32.xlu1 %v873_v51 }
 0x13c   : > { %883 = vadd.xlane.f32.xlu1 %v882_v53  ;;  %v1003_v53 = vadd.s32 4294967248, %v2363_v24 }
 0x13e   : > { %v1006_v28 = vsub.s32 %v1003_v53, %v2370_v39 }
 0x140   : > { %880 = vadd.xlane.f32.xlu1 %v879_v25 }
 0x144   : > { %889 = vadd.xlane.f32.xlu1 %v888_v42  ;;  %v985_v42 = vsub.s32 %v982_v46, %v2370_v39 }
 0x148   : > { %886 = vadd.xlane.f32.xlu1 %v885_v54 }
 0x14c   : > { %892 = vadd.xlane.f32.xlu1 %v891_v59  ;;  %v992_v59 = vsub.s32 %v989_v48, %v2370_v39  ;;  %v999_v48 = vsub.s32 %v996_v38, %v2370_v39  ;;  %v1038_v38 = vadd.s32 4294967208, %v2363_v24 }
 0x150   : > { %895 = vadd.xlane.f32.xlu1 %v894_v55 }
 0x17d   : > { %v806_v56 = vpop.xlane.xlu0 %805 }
 0x17e   : > { %v972_v20 = vrot.slane %v806_v56, %v971_v49 }
 0x181   : > { %v803_v36 = vpop.xlane.xlu0 %802 }
 0x182   : > { %v967_v51 = vrot.slane %v803_v36, %v966_v43 }
 0x184   : > { %v974_v36 = vsel %vm973_vm1, %v972_v20, %v967_v51  ;;  %v1013_v51 = vsub.s32 %v1010_v26, %v2370_v39  ;;  %v1024_v26 = vadd.s32 4294967224, %v2363_v24 }
 0x185   : > { %v812_v57 = vpop.xlane.xlu0 %811 }
 0x189   : > { %v809_v58 = vpop.xlane.xlu0 %808 }
 0x18a   : > { %v979_v54 = vrot.slane %v809_v58, %v978_v47 }
 0x18d   : > { %v2349_v45 = vpop.xlane.xlu0 %817 }
 0x191   : > { %v2351_v60 = vpop.xlane.xlu0 %814 }
 0x195   : > { %v2353_v52 = vpop.xlane.xlu0 %823 }
 0x199   : > { %v2355_v63 = vpop.xlane.xlu0 %820 }
 0x19d   : > { %v854_v61 = vpop.xlane.xlu1 %853  ;;  %v2357_v2 = vpop.xlane.xlu0 %829 }
 0x19e   : > { %v1080_v40 = vrot.slane %v854_v61, %v971_v49  ;;  %v986_v61 = vrot.slane %v812_v57, %v985_v42  ;;  %v1007_v57 = vrot.slane %v2355_v63, %v1006_v28  ;;  %v1045_v63 = vadd.s32 4294967200, %v2363_v24 }
 0x1a1   : > { %v851_v62 = vpop.xlane.xlu1 %850  ;;  %v2361_v21 = vpop.xlane.xlu0 %826 }
 0x1a2   : > { %v1076_v25 = vrot.slane %v851_v62, %v966_v43  ;;  %v1017_v62 = vadd.s32 4294967232, %v2363_v24  ;;  %v981_v43 = vsel %vm980_vm2, %v979_v54, %v974_v36 }
 0x1a3   : > { %v988_v20 = vsel %vm987_vm3, %v986_v61, %v981_v43  ;;  %v1041_v61 = vsub.s32 %v1038_v38, %v2370_v39 }
 0x1a4   : > { %v1081_v58 = vsel %vm973_vm1, %v1080_v40, %v1076_v25  ;;  %v1020_v25 = vsub.s32 %v1017_v62, %v2370_v39  ;;  %vm931_vm1 = vcmp.lt.s32.totalorder %v2363_v24, 16 }
 0x1a5   : > { %v860_v0 = vpop.xlane.xlu1 %859  ;;  %v2368_v22 = vpop.xlane.xlu0 %835 }
 0x1a6   : > { %v1090_v49 = vrot.slane %v860_v0, %v985_v42  ;;  %v1000_v0 = vrot.slane %v2349_v45, %v999_v48  ;;  %v1021_v45 = vrot.slane %v2361_v21, %v1020_v25  ;;  %v1059_v21 = vadd.s32 4294967184, %v2363_v24 }
 0x1a9   : > { %v857_v1 = vpop.xlane.xlu1 %856  ;;  %v2381_v37 = vpop.xlane.xlu0 %832 }
 0x1aa   : > { %v1085_v55 = vrot.slane %v857_v1, %v978_v47  ;;  %v993_v1 = vrot.slane %v2351_v60, %v992_v59  ;;  %v1031_v60 = vadd.s32 4294967216, %v2363_v24 }
 0x1ac   : > { %v1086_v56 = vsel %vm980_vm2, %v1085_v55, %v1081_v58  ;;  %v995_v55 = vsel %vm994_vm4, %v993_v1, %v988_v20  ;;  %v1034_v58 = vsub.s32 %v1031_v60, %v2370_v39  ;;  %v1048_v60 = vsub.s32 %v1045_v63, %v2370_v39 }
 0x1ad   : > { %v2359_v3 = vpop.xlane.xlu1 %865  ;;  %v2395_v46 = vpop.xlane.xlu0 %841  ;;  %v1091_v54 = vsel %vm987_vm3, %v1090_v49, %v1086_v56  ;;  %v1002_v62 = vsel %vm1001_vm5, %v1000_v0, %v995_v55  ;;  %v1027_v56 = vsub.s32 %v1024_v26, %v2370_v39  ;;  %vm1156_vm2 = vcmask 1041408  }
 0x1ae   : > { %v1100_v42 = vrot.slane %v2359_v3, %v999_v48  ;;  %v1014_v3 = vrot.slane %v2353_v52, %v1013_v51  ;;  %v1052_v48 = vadd.s32 4294967192, %v2363_v24  ;;  %vm1947_vm3 = vmmov 0  }
 0x1b1   : > { %v863_v23 = vpop.xlane.xlu1 %862  ;;  %v839_v40 = vpop.xlane.xlu0 %838 }
 0x1b2   : > { %v1095_v47 = vrot.slane %v863_v23, %v992_v59 }
 0x1b4   : > { %v1096_v23 = vsel %vm994_vm4, %v1095_v47, %v1091_v54 }
 0x1b5   : > { %v2365_v50 = vpop.xlane.xlu1 %871  ;;  %v845_v54 = vpop.xlane.xlu0 %844 }
 0x1b6   : > { %v1110_v47 = vrot.slane %v2365_v50, %v1013_v51  ;;  %v1028_v51 = vrot.slane %v2357_v2, %v1027_v56  ;;  %v1042_v2 = vrot.slane %v2368_v22, %v1041_v61 }
 0x1b9   : > { %v2373_v41 = vpop.xlane.xlu1 %868 }
 0x1ba   : > { %v1105_v59 = vrot.slane %v2373_v41, %v1006_v28  ;;  %v1101_v28 = vsel %vm1001_vm5, %v1100_v42, %v1096_v23  ;;  %v1009_v41 = vsel %vm1008_vm6, %v1007_v57, %v1002_v62  ;;  %v1066_v57 = vadd.s32 4294967176, %v2363_v24 }
 0x1bb   : > { %v1016_v20 = vsel %vm1015_vm7, %v1014_v3, %v1009_v41  ;;  %v1062_v42 = vsub.s32 %v1059_v21, %v2370_v39  ;;  %v1049_v62 = vrot.slane %v839_v40, %v1048_v60 }
 0x1bc   : > { %v1106_v43 = vsel %vm1008_vm6, %v1105_v59, %v1101_v28  ;;  %v1023_v52 = vsel %vm1022_vm8, %v1021_v45, %v1016_v20  ;;  %v1055_v59 = vsub.s32 %v1052_v48, %v2370_v39  ;;  %v1069_v63 = vsub.s32 %v1066_v57, %v2370_v39  ;;  %v848_v28 = vpop.xlane.xlu0 %847 }
 0x1bd   : > { %v2383_v44 = vpop.xlane.xlu1 %877  ;;  %v1030_v26 = vsel %vm1029_vm9, %v1028_v51, %v1023_v52  ;;  %v1063_v3 = vrot.slane %v845_v54, %v1062_v42 }
 0x1be   : > { %v1120_v23 = vrot.slane %v2383_v44, %v1027_v56  ;;  %v1056_v40 = vrot.slane %v2395_v46, %v1055_v59  ;;  %v1070_v48 = vrot.slane %v848_v28, %v1069_v63 }
 0x1c1   : > { %v875_v27 = vpop.xlane.xlu1 %874 }
 0x1c2   : > { %v1115_v1 = vrot.slane %v875_v27, %v1020_v25  ;;  %v1111_v27 = vsel %vm1015_vm7, %v1110_v47, %v1106_v43  ;;  %v1035_v25 = vrot.slane %v2381_v37, %v1034_v58 }
 0x1c4   : > { %v1116_v55 = vsel %vm1022_vm8, %v1115_v1, %v1111_v27  ;;  %v1037_v38 = vsel %vm1036_vm10, %v1035_v25, %v1030_v26 }
 0x1c5   : > { %v2399_v53 = vpop.xlane.xlu1 %883  ;;  %v1121_v37 = vsel %vm1029_vm9, %v1120_v23, %v1116_v55  ;;  %v1044_v45 = vsel %vm1043_vm11, %v1042_v2, %v1037_v38 }
 0x1c6   : > { %v1130_v44 = vrot.slane %v2399_v53, %v1041_v61  ;;  %v1051_v1 = vsel %vm1050_vm12, %v1049_v62, %v1044_v45 }
 0x1c9   : > { %v881_v36 = vpop.xlane.xlu1 %880 }
 0x1ca   : > { %v1125_v50 = vrot.slane %v881_v36, %v1034_v58 }
 0x1cc   : > { %v1126_v36 = vsel %vm1036_vm10, %v1125_v50, %v1121_v37  ;;  %v1946_v50 = vmov 0.0  }
 0x1cd   : > { %v890_v49 = vpop.xlane.xlu1 %889  ;;  %v1131_v43 = vsel %vm1043_vm11, %v1130_v44, %v1126_v36  ;;  %1661 = vmatprep.subr.mxu1 %v1946_v50  ;;  %1693 = vmatprep.mubr.msk.f32.mxu1 %vm1947_vm3, %v1946_v50 }
 0x1ce   : > { %v1140_v20 = vrot.slane %v890_v49, %v1055_v59  ;;  %1662 = vmatpush3.msra.mxu1 %v2133_v19  ;;  %v2623_v19 = vld [vmem:[#allocation10_spill] sm:$0xff] }
 0x1cf   : > { %1663 = vmatprep.subr.mxu1 %v1946_v50 }
 0x1d0   : > { %1664 = vmatpush3.msra.mxu1 %v2126_v18 }
 0x1d1   : > { %v887_v0 = vpop.xlane.xlu1 %886  ;;  %1665 = vmatprep.subr.mxu1 %v1946_v50 }
 0x1d2   : > { %v1135_v58 = vrot.slane %v887_v0, %v1048_v60  ;;  %v1058_v60 = vsel %vm1057_vm13, %v1056_v40, %v1051_v1  ;;  %1666 = vmatpush3.msra.mxu1 %v2123_v17 }
 0x1d3   : > { %v1065_v53 = vsel %vm1064_vm14, %v1063_v3, %v1058_v60  ;;  %1667 = vmatprep.subr.mxu1 %v1946_v50 }
 0x1d4   : > { %v1136_v56 = vsel %vm1050_vm12, %v1135_v58, %v1131_v43  ;;  %v1072_v52 = vsel %vm1071_vm15, %v1070_v48, %v1065_v53  ;;  %1668 = vmatpush3.msra.mxu1 %v2116_v16 }
 0x1d5   : > { %v893_v41 = vpop.xlane.xlu1 %892  ;;  %v1141_v21 = vsel %vm1057_vm13, %v1140_v20, %v1136_v56  ;;  %1669 = vmatprep.subr.mxu1 %v1946_v50 }
 0x1d6   : > { %v1145_v47 = vrot.slane %v893_v41, %v1062_v42  ;;  %1670 = vmatpush3.msra.mxu1 %v2113_v15 }
 0x1d7   : > { %1671 = vmatprep.subr.mxu1 %v1946_v50 }
 0x1d8   : > { %v1146_v61 = vsel %vm1064_vm14, %v1145_v47, %v1141_v21  ;;  %1672 = vmatpush3.msra.mxu1 %v2106_v14 }
 0x1d9   : > { %v896_v22 = vpop.xlane.xlu1 %895  ;;  %1673 = vmatprep.subr.mxu1 %v1946_v50 }
 0x1da   : > { %v1150_v27 = vrot.slane %v896_v22, %v1069_v63  ;;  %1674 = vmatpush3.msra.mxu1 %v2103_v13 }
 0x1db   : > { %1675 = vmatprep.subr.mxu1 %v1946_v50 }
 0x1dc   : > { %v1151_v25 = vsel %vm1071_vm15, %v1150_v27, %v1146_v61  ;;  %1676 = vmatpush3.msra.mxu1 %v2096_v12 }
 0x1dd   : > { %v1153_v54 = vsel %vm1152_vm0, %v1151_v25, %v1072_v52  ;;  %1677 = vmatprep.subr.mxu1 %v1946_v50 }
 0x1de   : > { %v1155_v55 = vsel %vm931_vm1, %v1153_v54, -1e+30  ;;  %1678 = vmatpush3.msra.mxu1 %v2093_v11 }
 0x1df   : > { %v1157_v46 = vsel %vm1156_vm2, %v1155_v55, -inf  ;;  %1679 = vmatprep.subr.mxu1 %v1946_v50 }
 0x1e0   : > { %1158 = vmax.xlane.f32.xlu0 %v1157_v46  ;;  %1680 = vmatpush3.msra.mxu1 %v2086_v10 }
 0x1e1   : > { %1681 = vmatprep.subr.mxu1 %v1946_v50 }
 0x1e2   : > { %1682 = vmatpush3.msra.mxu1 %v2083_v9 }
 0x1e3   : > { %1683 = vmatprep.subr.mxu1 %v1946_v50 }
 0x1e4   : > { %1684 = vmatpush3.msra.mxu1 %v2076_v8 }
 0x1e5   : > { %1685 = vmatprep.subr.mxu1 %v1946_v50 }
 0x1e6   : > { %1686 = vmatpush3.msra.mxu1 %v2073_v7 }
 0x1e7   : > { %1687 = vmatprep.subr.mxu1 %v1946_v50 }
 0x1e8   : > { %1688 = vmatpush3.msra.mxu1 %v2064_v6  ;;  %v1948_v6 = vmov 1966171168  }
 0x1e9   : > { %1689 = vmatprep.subr.mxu1 %v1946_v50  ;;  %v1170_v12 = vunpack.c.l.s4 %v1948_v6 }
 0x1ea   : > { %1690 = vmatpush3.msra.mxu1 %v2061_v5 }
 0x1eb   : > { %1691 = vmatprep.subr.mxu1 %v1946_v50 }
 0x1ec   : > { %1692 = vmatpush3.msra.mxu1 %v2058_v4  ;;  %v1171_v4 = vunpack.c.0.s8 %v1170_v12 }
 0x1ed   : > { %1696 = vmatprep.subr.mxu1 %v1946_v50 }
 0x1ee   : > { %v1174_v13 = vsub.s32 %v1171_v4, %v2370_v39  ;;  %v1853_v39 = vld [vmem:[%s2055_s26 + $0x80] sm:$0xff] }
 0x269   : > { %v1159_v8 = vpop.xlane.xlu0 %1158 }
 0x26a   : > { %v1160_v9 = vsub.f32 %v1155_v55, %v1159_v8 }
 0x26c   : > { %v1161_v10 = vmul.f32 1.442695, %v1160_v9 }
 0x26e   : > { %1844 = vpow2.f32 %v1161_v10 }
 0x27b   : > { %v1845_v7 = vpop.eup %1844 }
 0x27c   : > { %v1163_v11 = vsel %vm1156_vm2, %v1845_v7, 0.0 }
 0x27d   : > { %1164 = vadd.xlane.f32.xlu1 %v1163_v11 }
 0x306   : > { %v1165_v5 = vpop.xlane.xlu1 %1164 }
 0x307   : > { %1846 = vrcp.f32 %v1165_v5 }
 0x314   : > { %v1847_v14 = vpop.eup %1846 }
 0x315   : > { %v1167_v15 = vmul.f32 %v1847_v14, %v1845_v7 }
 0x317   : > { %v1175_v16 = vrot.slane %v1167_v15, %v1174_v13 }
 0x319   : > { %v1183_v17 = vrot.slane %v1175_v16, %v1174_v13  ;;  %v1176_v18 = vcombine.high %v1175_v16, %v1175_v16  ;;  %1522 = vst.sshfl [vmem:[%s2482_s16] sm:$0x1 pattern:$0x73625140] %v1175_v16 }
 0x31b   : > { %1694 = vmatmul.mubr.f32.vlgmr.msra.gmra.mxu1 %v1183_v17  ;;  %1523 = vst.sshfl [vmem:[%s2482_s16 + $0x1] sm:$0x1 pattern:$0x73625140] %v1176_v18  ;;  %v1190_v24 = vrot.slane %v1176_v18, %v1174_v13 }
 0x31c   : > { %1697 = vmatpush3.msra.mxu1 %v2195_v35  ;;  %1728 = vmatprep.mubr.msk.f32.mxu1 %vm1947_vm3, %v1946_v50  ;;  %v1852_v35 = vld [vmem:[%s2055_s26 + $0x88] sm:$0xff] }
 0x31d   : > { %1698 = vmatprep.subr.mxu1 %v1946_v50 }
 0x31e   : > { %1699 = vmatpush3.msra.mxu1 %v2188_v34  ;;  %v1851_v34 = vld [vmem:[%s2055_s26 + $0x90] sm:$0xff] }
 0x31f   : > { %1700 = vmatprep.subr.mxu1 %v1946_v50 }
 0x320   : > { %1701 = vmatpush3.msra.mxu1 %v2185_v33  ;;  %v1850_v33 = vld [vmem:[%s2055_s26 + $0x98] sm:$0xff] }
 0x321   : > { %1702 = vmatprep.subr.mxu1 %v1946_v50 }
 0x322   : > { %1703 = vmatpush3.msra.mxu1 %v2178_v32  ;;  %v2624_v32 = vld [vmem:[#allocation9_spill] sm:$0xff] }
 0x323   : > { %1704 = vmatprep.subr.mxu1 %v1946_v50 }
 0x324   : > { %1705 = vmatpush3.msra.mxu1 %v2175_v31  ;;  %v2625_v31 = vld [vmem:[#allocation8_spill] sm:$0xff] }
 0x325   : > { %1706 = vmatprep.subr.mxu1 %v1946_v50 }
 0x326   : > { %1707 = vmatpush3.msra.mxu1 %v2168_v30  ;;  %v1848_v30 = vld [vmem:[%s2055_s26 + $0xa8] sm:$0xff] }
 0x327   : > { %1708 = vmatprep.subr.mxu1 %v1946_v50 }
 0x328   : > { %1709 = vmatpush3.msra.mxu1 %v2165_v29  ;;  %v1849_v29 = vld [vmem:[%s2055_s26 + $0xa0] sm:$0xff]  ;;  %s1949_s26 = smov [#allocation2]  }
 0x329   : > { %1710 = vmatprep.subr.mxu1 %v1946_v50  ;;  %s1858_s10 = sshll.u32 %s1949_s26, 4  ;;  %s1859_s10 = int_to_ptr.vmem [resolvable:$false] %s1858_s10 }
 0x32a   : > { %1711 = vmatpush3.msra.mxu1 %v2623_v19  ;;  %s1860_s11 = scalar_lea.vmem %s1859_s10, 64  ;;  %p1861_p0 = scmp.lt.s32.totalorder %s2520_s17, %s1859_s10 }
 0x32b   : > { %1712 = vmatprep.subr.mxu1 %v1946_v50  ;;  %p1862_p1 = scmp.lt.s32.totalorder %s1860_s11, %s1854_s9 }
 0x32c   : > { %1713 = vmatpush3.msra.mxu1 %v2624_v32 }
 0x32d   : > { %1714 = vmatprep.subr.mxu1 %v1946_v50  ;;  %p1863_p2 = por %p1862_p1, %p1861_p0 }
 0x32e   : > { %1715 = vmatpush3.msra.mxu1 %v2625_v31 }
 0x32f   : > { %1716 = vmatprep.subr.mxu1 %v1946_v50  ;;  %p1864_p3 = pnand %p1863_p2, %p1857_p13 }
 0x330   : > { %1717 = vmatpush3.msra.mxu1 %v1848_v30 }
 0x331   : > { %1718 = vmatprep.subr.mxu1 %v1946_v50 }
 0x332   : > { %1719 = vmatpush3.msra.mxu1 %v1849_v29 }
 0x333   : > { %1720 = vmatprep.subr.mxu1 %v1946_v50 }
 0x334   : > { %1721 = vmatpush3.msra.mxu1 %v1850_v33 }
 0x335   : > { %1722 = vmatprep.subr.mxu1 %v1946_v50 }
 0x336   : > { %1723 = vmatpush3.msra.mxu1 %v1851_v34 }
 0x337   : > { %1724 = vmatprep.subr.mxu1 %v1946_v50 }
 0x338   : > { %1725 = vmatpush3.msra.mxu1 %v1852_v35 }
 0x339   : > { %1726 = vmatprep.subr.mxu1 %v1946_v50 }
 0x33a   : > { %1727 = vmatpush3.msra.mxu1 %v1853_v39 }
 0x33b   : > { %1729 = vmatmul.mubr.f32.vlgmr.msra.gmra.mxu1 %v1190_v24 }
 0x33c   : > { %1867 = shalt.err (!%p1864_p3)
}
 0x33d   : > { %s1868_s12 = scalar_lea.hbm %s2528_s28, 32  ;;  %s1872_s19 = scalar_lea.hbm %s2613_s5, 128 }
 0x33e   : > { %p1869_p4 = scmp.ne.s32.totalorder %s2528_s28, %s1868_s12  ;;  %p1873_p9 = scmp.lt.s32.totalorder %s2528_s28, %s2613_s5 }
 0x33f   : > { %p1874_p10 = scmp.lt.s32.totalorder %s1872_s19, %s1868_s12 }
 0x340   : > { %p1870_p7 = pnand %p1869_p4, %p2026_p5 }
 0x341   : > { %p1875_p11 = por %p1874_p10, %p1873_p9 }
 0x342   : > { %p1871_p8 = pneg %p1870_p7 }
 0x344   : > { %p1876_p12 = pnand %p1875_p11, %p1871_p8 }
 0x346   : > { %1879 = shalt.err (!%p1876_p12)
}
 0x347   : > { %s1950_s9 = smov 16   ;;  %s1951_s10 = smov 1   ;;  %vm1335_vm4 = vcmask 253952  }
 0x348   : > { %1731 = dma.vmem_to_hbm [thread:$0]  (%p2026_p5), %s2520_s17, 32, %s2528_s28, %s1339_s29, %s1950_s9, %s1950_s9, %s1951_s10  }
 0x349   : > { %s272_s11 = scalar_lea.vmem [#allocation4], %s1480_s15  ;;  %s2565_s19 = scalar_lea.hbm %s2614_s6, %s1533_s18 }
 0x34a   : > { %s1373_s12 = sshll.u32 %s272_s11, 4  ;;  %s1344_s17 = scalar_lea.sflag [#allocation5], %s2476_s14  ;;  %s2558_s12 = int_to_ptr.vmem [resolvable:$true] %s1373_s12 }
 0x34b   : > { %s1880_s28 = scalar_lea.vmem %s2558_s12, 32  ;;  %s1952_s15 = smov [#allocation4]  }
 0x34c   : > { %p1881_p13 = scmp.ne.s32.totalorder %s2558_s12, %s1880_s28  ;;  %s1884_s29 = sshll.u32 %s1952_s15, 4  ;;  %s1885_s29 = int_to_ptr.vmem [resolvable:$false] %s1884_s29 }
 0x34d   : > { %s1886_s25 = scalar_lea.vmem %s1885_s29, 64  ;;  %p1887_p2 = scmp.lt.s32.totalorder %s2558_s12, %s1885_s29 }
 0x34e   : > { %p1882_p0 = pnand %p1881_p13, %p2026_p5  ;;  %p1888_p3 = scmp.lt.s32.totalorder %s1886_s25, %s1880_s28 }
 0x350   : > { %p1883_p1 = pneg %p1882_p0  ;;  %p1889_p4 = por %p1888_p3, %p1887_p2 }
 0x352   : > { %p1890_p7 = pnand %p1889_p4, %p1883_p1 }
 0x3db   : > { %v1261_v49 = vpop.f32.mrf.mxu1 }
 0x3dc   : > { %1336 = vst.msk [vmem:[%s272_s11] sm:$0x1] %vm1335_vm4, %v1261_v49 }
 0x3dd   : > { %v1695_v51 = vpop.f32.mrf.mxu1 }
 0x3fb   : > { %v1331_v57 = vpop.f32.mrf.mxu1 }
 0x3fc   : > { %1337 = vst.msk [vmem:[%s272_s11 + $0x1] sm:$0x1] %vm1335_vm4, %v1331_v57 }
 0x3fd   : > { %v1730_v23 = vpop.f32.mrf.mxu1 }
 0x3fe   : > { %1893 = shalt.err (!%p1890_p7)
}
 0x3ff   : > { %s1894_s18 = scalar_lea.hbm %s2565_s19, 32  ;;  %s1898_s26 = scalar_lea.hbm %s2614_s6, 128 }
 0x400   : > { %p1895_p8 = scmp.ne.s32.totalorder %s2565_s19, %s1894_s18  ;;  %p1899_p11 = scmp.lt.s32.totalorder %s2565_s19, %s2614_s6 }
 0x401   : > { %p1900_p12 = scmp.lt.s32.totalorder %s1898_s26, %s1894_s18 }
 0x402   : > { %p1896_p9 = pnand %p1895_p8, %p2026_p5 }
 0x403   : > { %p1901_p13 = por %p1900_p12, %p1899_p11 }
 0x404   : > { %p1897_p10 = pneg %p1896_p9 }
 0x406   : > { %p1902_p0 = pnand %p1901_p13, %p1897_p10 }
 0x408   : > { %1905 = shalt.err (!%p1902_p0)
}
 0x409   : > { %1732 = dma.vmem_to_hbm [thread:$0]  (%p2026_p5), %s2558_s12, 32, %s2565_s19, %s1344_s17, %s1950_s9, %s1950_s9, %s1951_s10  }
 0x40a PF: > { %p1742_p1 = scmp.ge.s32.totalorder %s1944_s24, 2  ;;  %s1388_s16 = sand.u32 1, %s1932_s21  }
 0x40b   : > { %s1389_s28 = scalar_lea.sflag [#allocation3], %s1388_s16 }
 0x40c   : > { %p1736_p2 = pnand %p1742_p1, %p2030_p6 }
 0x40e   : > { %p1737_p3 = pneg %p1736_p2 }
 0x410   : > { %1923 = dma.done.wait (%p1737_p3), %s1389_s28, 32  }
 0x411   : > { %1925 = vsyncadd (%p1737_p3), %s1389_s28, 4294967264  ;;  %s1398_s15 = scalar_lea.sflag [#allocation5], %s1388_s16 }
 0x412   : > { %1927 = dma.done.wait (%p1737_p3), %s1398_s15, 32  }
 0x413   : > { %1929 = vsyncadd (%p1737_p3), %s1398_s15, 4294967264  ;;  %p20_p5 = scmp.ge.s32.totalorder %s2013_s27, 6   ;;  %s2626_s21 = smov %s1936_s22 }
 0x414   : > { %s2627_s22 = smov %s1940_s23  ;;  %s2628_s23 = smov %s2024_s30 }
 0x415   : > { %s2629_s24 = smov %s2013_s27  ;;  %22 = sbr.rel (!%p20_p5) target bundleno = 5 (0x5), region = 95 }
 0x41a   :  { %1403 = vsyncpa [#allocation3], 1 }
 0x41b   :  { %1405 = vsyncpa [#allocation3 + $0x1], 1 }
 0x41c   :  { %1406 = vsyncpa [#allocation5], 1 }
 0x41d   :  { %1408 = vsyncpa [#allocation5 + $0x1], 1 }

</bundles_post_ra>
